<compile_context>
chip_gen: v7x
topology: tpu7x:2x2x1
jax: 0.10.0
libtpu: 0.0.40
codegen_flags: <defaults>
</compile_context>

<pallas_src>
import jax
import jax.numpy as jnp
from jax import lax
from jax.experimental import pallas as pl
from jax.experimental.pallas import tpu as pltpu


# ----------------------------- Pallas kernel ---------------------------------
def ntdsgcn_fused_kernel(x_ref, h0_ref, c0_ref, p0_ref,
                         wgc_ref, wxz_ref, wgh_ref, wgp_ref, wghp_ref,
                         bg_ref, nw_ref,
                         gc_out_ref, h_out_ref, c_out_ref):
    """Runs the whole T-step ntDSGCN recurrence in one kernel invocation.

    x_ref    : (T, B, F)   input sequence (resident in VMEM)
    h0/c0/p0 : (B, F)      initial Hidden / Cell / pred states
    wgc_ref  : (F, K*F)    pre-fused  concat_k (A_k * W_k)^T
    wxz_ref  : (F, 4F)     pre-fused  wgc_all @ wg_gc   (x -> gates, no gc dep)
    wgh_ref  : (F, 4F)     gate weights for Hidden rows
    wgp_ref  : (F, 4F)     gate weights for pred rows   (only used at t == 0)
    wghp_ref : (F, 4F)     wgh + wgp                    (used for t >= 1)
    bg_ref   : (1, 4F)     fused gate bias  [bf | bi | bo | bC]
    nw_ref   : (1, F)      precomputed  A_{K-1} @ Neighbor_weight
    gc_out   : (T, B, K*F) per-step graph-conv output
    h_out    : (T, B, F)   per-step Hidden_State
    c_out    : (T, B, F)   per-step Cell_State
    """
    T = x_ref.shape[0]
    B, Fn = h0_ref.shape

    # Weights / constants read once, broadcasts hoisted out of the time loop.
    wgc = wgc_ref[...]
    wxz = wxz_ref[...]
    wghp = wghp_ref[...]
    bg = jnp.broadcast_to(bg_ref[...], (B, 4 * Fn))
    nw = jnp.broadcast_to(nw_ref[...], (B, Fn))

    def gates(z):
        f = jax.nn.sigmoid(z[:, 0 * Fn:1 * Fn])
        i = jax.nn.sigmoid(z[:, 1 * Fn:2 * Fn])
        o = jax.nn.sigmoid(z[:, 2 * Fn:3 * Fn])
        Cg = jnp.tanh(z[:, 3 * Fn:4 * Fn])
        return f, i, o, Cg

    # ---- t == 0 peeled: pred0 may differ from Hidden0 ------------------------
    x0 = x_ref[0]
    gc0 = jnp.dot(x0, wgc, preferred_element_type=jnp.float32)
    z0 = (jnp.dot(x0, wxz, preferred_element_type=jnp.float32)
          + jnp.dot(h0_ref[...], wgh_ref[...], preferred_element_type=jnp.float32)
          + jnp.dot(p0_ref[...], wgp_ref[...], preferred_element_type=jnp.float32)
          + bg)
    f, i, o, Cg = gates(z0)
    C1 = f * (c0_ref[...] * nw) + i * Cg
    H1 = o * jnp.tanh(C1)
    gc_out_ref[0] = gc0
    h_out_ref[0] = H1
    c_out_ref[0] = C1

    # ---- t >= 1: pred == Hidden, fused (wg_h + wg_p) -------------------------
    def body(t, carry):
        H, C = carry
        x = x_ref[t]
        gc = jnp.dot(x, wgc, preferred_element_type=jnp.float32)
        z = (jnp.dot(x, wxz, preferred_element_type=jnp.float32)
             + jnp.dot(H, wghp, preferred_element_type=jnp.float32)
             + bg)
        f, i, o, Cg = gates(z)
        C_new = f * (C * nw) + i * Cg
        H_new = o * jnp.tanh(C_new)
        gc_out_ref[t] = gc
        h_out_ref[t] = H_new
        c_out_ref[t] = C_new
        return (H_new, C_new)

    if T > 1:
        lax.fori_loop(1, T, body, (H1, C1), unroll=True)


# --------------------- one-time parameter preparation ------------------------
def prepare_params(A_stack, W_gc, Wf, bf, Wi, bi, Wo, bo, WC, bC, neighbor_w):
    """Fuse / transpose weights ONCE at model-build time (not per step)."""
    K, F, _ = A_stack.shape
    # concat_k (A_k * W_k)^T  -> (F, K*F)
    wgc_all = jnp.concatenate([(A_stack[k] * W_gc[k]).T for k in range(K)],
                              axis=1)
    # [Wf^T | Wi^T | Wo^T | WC^T] -> ((K+2)F, 4F), split by `combined` blocks.
    wg = jnp.concatenate([Wf.T, Wi.T, Wo.T, WC.T], axis=1)
    wg_gc = wg[:K * F]                    # rows multiplying gc
    wg_h = wg[K * F:(K + 1) * F]          # rows multiplying Hidden
    wg_p = wg[(K + 1) * F:(K + 2) * F]    # rows multiplying pred
    wg_hp = wg_h + wg_p                   # valid whenever pred == Hidden (t>0)
    wxz = wgc_all @ wg_gc                 # (F, 4F): x -> gates, no gc dependency
    bg = jnp.concatenate([bf, bi, bo, bC]).reshape(1, 4 * F)
    # torch.mv(A_{K-1}, Neighbor_weight) -> (1, F)
    nw = (A_stack[K - 1] @ neighbor_w).reshape(1, F)
    f32 = lambda a: a.astype(jnp.float32)
    return tuple(f32(a) for a in (wgc_all, wxz, wg_h, wg_p, wg_hp, bg, nw))


# ------------------------------ wrappers --------------------------------------
def ntdsgcn_loop(x_seq, H0, C0, pred0, params):
    """Run all T recurrent steps in a single pallas_call (grid=(1,)).

    Returns per-step (Hidden, Cell, gc, pred), each stacked along time.
    """
    wgc_all, wxz, wg_h, wg_p, wg_hp, bg, nw = params
    T, B, F = x_seq.shape
    KF = wgc_all.shape[1]
    c2 = lambda t: (0, 0)
    c3 = lambda t: (0, 0, 0)

    gc_seq, H_seq, C_seq = pl.pallas_call(
        ntdsgcn_fused_kernel,
        out_shape=(
            jax.ShapeDtypeStruct((T, B, KF), jnp.float32),   # gc per step
            jax.ShapeDtypeStruct((T, B, F), jnp.float32),    # Hidden per step
            jax.ShapeDtypeStruct((T, B, F), jnp.float32),    # Cell per step
        ),
        grid_spec=pltpu.PrefetchScalarGridSpec(
            num_scalar_prefetch=0,
            grid=(1,),
            in_specs=[
                pl.BlockSpec((T, B, F), c3),        # x_seq (fully resident)
                pl.BlockSpec((B, F), c2),           # H0
                pl.BlockSpec((B, F), c2),           # C0
                pl.BlockSpec((B, F), c2),           # pred0
                pl.BlockSpec((F, KF), c2),          # fused gc weights
                pl.BlockSpec((F, 4 * F), c2),       # W_xz (x -> gates)
                pl.BlockSpec((F, 4 * F), c2),       # gate W (Hidden rows)
                pl.BlockSpec((F, 4 * F), c2),       # gate W (pred rows)
                pl.BlockSpec((F, 4 * F), c2),       # gate W (Hidden+pred fused)
                pl.BlockSpec((1, 4 * F), c2),       # gate bias
                pl.BlockSpec((1, F), c2),           # neighbor vector
            ],
            out_specs=[
                pl.BlockSpec((T, B, KF), c3),
                pl.BlockSpec((T, B, F), c3),
                pl.BlockSpec((T, B, F), c3),
            ],
        ),
        compiler_params=pltpu.CompilerParams(
            dimension_semantics=("arbitrary",)),
    )(x_seq, H0, C0, pred0, wgc_all, wxz, wg_h, wg_p, wg_hp, bg, nw)

    pred_seq = H_seq                      # pred == Hidden_State
    return H_seq, C_seq, gc_seq, pred_seq


def ntdsgcn_forward(x, H, C, pred, params):
    """Single time-step forward() — the T=1 case of the fused loop."""
    H_seq, C_seq, gc_seq, pred_seq = ntdsgcn_loop(x[None], H, C, pred, params)
    return H_seq[0], C_seq[0], gc_seq[0], pred_seq[0]


# ------------------------- pure-JAX reference ---------------------------------
def reference(x, H, C, pred, A_stack, W_gc, Wf, bf, Wi, bi, Wo, bo, WC, bC,
              nw_vec):
    K = A_stack.shape[0]
    gcs = [x @ (A_stack[k] * W_gc[k]).T for k in range(K)]
    gc = jnp.concatenate(gcs, axis=1)
    combined = jnp.concatenate([gc, H, pred], axis=1)
    f = jax.nn.sigmoid(combined @ Wf.T + bf)
    i = jax.nn.sigmoid(combined @ Wi.T + bi)
    o = jax.nn.sigmoid(combined @ Wo.T + bo)
    Cg = jnp.tanh(combined @ WC.T + bC)
    NC = C * (A_stack[-1] @ nw_vec)
    C_new = f * NC + i * Cg
    H_new = o * jnp.tanh(C_new)
    return H_new, C_new, gc, H_new


# ------------------------- __init__-equivalent setup ---------------------------
def build_A_list(A, K, clamp=True):
    d = jnp.sum(A, axis=0)                     # torch.sum(A, 0)
    D_inv = jnp.diag(1.0 / d)
    norm_A = D_inv @ A
    A_temp = jnp.eye(A.shape[0], dtype=A.dtype)
    A_list = []
    for _ in range(K):
        A_temp = A_temp @ norm_A
        if clamp:
            A_temp = jnp.minimum(A_temp, 1.0)  # torch.clamp(max=1.0)
        A_list.append(A_temp)
    return jnp.stack(A_list)


if __name__ == "__main__":
    B, F, K, T = 8, 32, 3, 6              # batch, nodes(=hidden), K-hop, steps
    gc_in = K * F + 2 * F                  # gate Linear input size

    key = jax.random.PRNGKey(0)
    ks = jax.random.split(key, 16)

    def unif(k, shape, s):
        return jax.random.uniform(k, shape, minval=-s, maxval=s,
                                  dtype=jnp.float32)

    # adjacency (positive column sums so D_inverse is finite)
    A = (jax.random.uniform(ks[0], (F, F), dtype=jnp.float32)
         + jnp.eye(F, dtype=jnp.float32))
    A_stack = build_A_list(A, K, clamp=True)

    stdv_f = 1.0 / (F ** 0.5)
    stdv_g = 1.0 / (gc_in ** 0.5)
    W_gc = unif(ks[1], (K, F, F), stdv_f)                 # FilterLinear weights
    Wf, bf = unif(ks[2], (F, gc_in), stdv_g), unif(ks[3], (F,), stdv_g)
    Wi, bi = unif(ks[4], (F, gc_in), stdv_g), unif(ks[5], (F,), stdv_g)
    Wo, bo = unif(ks[6], (F, gc_in), stdv_g), unif(ks[7], (F,), stdv_g)
    WC, bC = unif(ks[8], (F, gc_in), stdv_g), unif(ks[9], (F,), stdv_g)
    neighbor_w = unif(ks[10], (F,), stdv_f)               # Neighbor_weight

    # inputs / initial states
    x_seq = jax.random.normal(ks[11], (T, B, F), dtype=jnp.float32)
    H0 = jax.random.normal(ks[12], (B, F), dtype=jnp.float32) * 0.1
    C0 = jax.random.normal(ks[13], (B, F), dtype=jnp.float32) * 0.1
    pred0 = jax.random.normal(ks[14], (B, F), dtype=jnp.float32) * 0.1

    # one-time weight fusion (hoisted out of the per-step path)
    params = prepare_params(A_stack, W_gc, Wf, bf, Wi, bi, Wo, bo, WC, bC,
                            neighbor_w)

    # --- fused multi-step kernel vs. pure-JAX recurrence ----------------------
    loop_fn = jax.jit(ntdsgcn_loop)
    H_seq, C_seq, gc_seq, pred_seq = jax.block_until_ready(
        loop_fn(x_seq, H0, C0, pred0, params))

    # Tolerances slightly looser than before: the W_xz / wg_hp pre-fusions
    # change f32 summation order (mathematically identical).
    atol = rtol = 1e-3
    Hr, Cr, pr = H0, C0, pred0
    for t in range(T):
        Hr, Cr, gcr, pr = reference(x_seq[t], Hr, Cr, pr, A_stack, W_gc,
                                    Wf, bf, Wi, bi, Wo, bo, WC, bC, neighbor_w)
        assert jnp.allclose(H_seq[t], Hr, atol=atol, rtol=rtol), ("Hidden", t)
        assert jnp.allclose(C_seq[t], Cr, atol=atol, rtol=rtol), ("Cell", t)
        assert jnp.allclose(gc_seq[t], gcr, atol=atol, rtol=rtol), ("gc", t)
        assert jnp.allclose(pred_seq[t], pr, atol=atol, rtol=rtol), ("pred", t)

    # --- single-step forward() semantics (T = 1) -------------------------------
    fwd = jax.jit(ntdsgcn_forward)
    outs = jax.block_until_ready(fwd(x_seq[0], H0, C0, pred0, params))
    refs = reference(x_seq[0], H0, C0, pred0, A_stack, W_gc,
                     Wf, bf, Wi, bi, Wo, bo, WC, bC, neighbor_w)
    names = ("Hidden_State", "Cell_State", "gc", "pred")
    for name, got, exp in zip(names, outs, refs):
        assert got.shape == exp.shape, (name, got.shape, exp.shape)
        assert jnp.allclose(got, exp, atol=atol, rtol=rtol), name

    print("KERNEL_OK")
</pallas_src>

<mosaic_0001>
module attributes {stable_mosaic.version = 11 : i64} {
  func.func @ntdsgcn_fused_kernel(%arg0: i32, %arg1: memref<6x8x32xf32, #tpu.memory_space<vmem>>, %arg2: memref<8x32xf32, #tpu.memory_space<vmem>>, %arg3: memref<8x32xf32, #tpu.memory_space<vmem>>, %arg4: memref<8x32xf32, #tpu.memory_space<vmem>>, %arg5: memref<32x96xf32, #tpu.memory_space<vmem>>, %arg6: memref<32x128xf32, #tpu.memory_space<vmem>>, %arg7: memref<32x128xf32, #tpu.memory_space<vmem>>, %arg8: memref<32x128xf32, #tpu.memory_space<vmem>>, %arg9: memref<32x128xf32, #tpu.memory_space<vmem>>, %arg10: memref<1x128xf32, #tpu.memory_space<vmem>>, %arg11: memref<1x32xf32, #tpu.memory_space<vmem>>, %arg12: memref<6x8x96xf32, #tpu.memory_space<vmem>>, %arg13: memref<6x8x32xf32, #tpu.memory_space<vmem>>, %arg14: memref<6x8x32xf32, #tpu.memory_space<vmem>>) attributes {dimension_semantics = [#tpu.dimension_semantics<arbitrary>], iteration_bounds = array<i64: 1>, scalar_prefetch = 0 : i64, scratch_operands = 0 : i64, tpu.core_type = #tpu.core_type<tc>, window_params = [{pipeline_mode = #tpu.pipeline_mode<synchronous>, transform_indices = @transform_0, window_bounds = array<i64: 6, 8, 32>}, {pipeline_mode = #tpu.pipeline_mode<synchronous>, transform_indices = @transform_1, window_bounds = array<i64: 8, 32>}, {pipeline_mode = #tpu.pipeline_mode<synchronous>, transform_indices = @transform_2, window_bounds = array<i64: 8, 32>}, {pipeline_mode = #tpu.pipeline_mode<synchronous>, transform_indices = @transform_3, window_bounds = array<i64: 8, 32>}, {pipeline_mode = #tpu.pipeline_mode<synchronous>, transform_indices = @transform_4, window_bounds = array<i64: 32, 96>}, {pipeline_mode = #tpu.pipeline_mode<synchronous>, transform_indices = @transform_5, window_bounds = array<i64: 32, 128>}, {pipeline_mode = #tpu.pipeline_mode<synchronous>, transform_indices = @transform_6, window_bounds = array<i64: 32, 128>}, {pipeline_mode = #tpu.pipeline_mode<synchronous>, transform_indices = @transform_7, window_bounds = array<i64: 32, 128>}, {pipeline_mode = #tpu.pipeline_mode<synchronous>, transform_indices = @transform_8, window_bounds = array<i64: 32, 128>}, {pipeline_mode = #tpu.pipeline_mode<synchronous>, transform_indices = @transform_9, window_bounds = array<i64: 1, 128>}, {pipeline_mode = #tpu.pipeline_mode<synchronous>, transform_indices = @transform_10, window_bounds = array<i64: 1, 32>}, {pipeline_mode = #tpu.pipeline_mode<synchronous>, transform_indices = @transform_11, window_bounds = array<i64: 6, 8, 96>}, {pipeline_mode = #tpu.pipeline_mode<synchronous>, transform_indices = @transform_12, window_bounds = array<i64: 6, 8, 32>}, {pipeline_mode = #tpu.pipeline_mode<synchronous>, transform_indices = @transform_13, window_bounds = array<i64: 6, 8, 32>}]} {
    %c0 = arith.constant 0 : index
    %c0_0 = arith.constant 0 : index
    %0 = vector.load %arg5[%c0, %c0_0] : memref<32x96xf32, #tpu.memory_space<vmem>>, vector<32x96xf32>
    %c0_1 = arith.constant 0 : index
    %c0_2 = arith.constant 0 : index
    %1 = vector.load %arg6[%c0_1, %c0_2] : memref<32x128xf32, #tpu.memory_space<vmem>>, vector<32x128xf32>
    %c0_3 = arith.constant 0 : index
    %c0_4 = arith.constant 0 : index
    %2 = vector.load %arg9[%c0_3, %c0_4] : memref<32x128xf32, #tpu.memory_space<vmem>>, vector<32x128xf32>
    %c0_5 = arith.constant 0 : index
    %c0_6 = arith.constant 0 : index
    %3 = vector.load %arg10[%c0_5, %c0_6] : memref<1x128xf32, #tpu.memory_space<vmem>>, vector<1x128xf32>
    %4 = vector.shape_cast %3 : vector<1x128xf32> to vector<1x128xf32>
    %5 = vector.broadcast %4 : vector<1x128xf32> to vector<8x128xf32>
    %c0_7 = arith.constant 0 : index
    %c0_8 = arith.constant 0 : index
    %6 = vector.load %arg11[%c0_7, %c0_8] : memref<1x32xf32, #tpu.memory_space<vmem>>, vector<1x32xf32>
    %7 = vector.shape_cast %6 : vector<1x32xf32> to vector<1x32xf32>
    %8 = vector.broadcast %7 : vector<1x32xf32> to vector<8x32xf32>
    %c0_9 = arith.constant 0 : index
    %c0_10 = arith.constant 0 : index
    %c0_11 = arith.constant 0 : index
    %9 = vector.load %arg1[%c0_9, %c0_10, %c0_11] : memref<6x8x32xf32, #tpu.memory_space<vmem>>, vector<1x8x32xf32>
    %10 = vector.shape_cast %9 : vector<1x8x32xf32> to vector<8x32xf32>
    %cst = arith.constant dense<0.000000e+00> : vector<8x96xf32>
    %11 = tpu.matmul %10, %0, %cst {dimension_numbers = #tpu.dot_dimension_numbers<[1], [0], [0], [1], [0, 0, 1, 1], [], []>} : vector<8x32xf32>, vector<32x96xf32>, vector<8x96xf32> -> vector<8x96xf32>
    %cst_12 = arith.constant dense<0.000000e+00> : vector<8x128xf32>
    %12 = tpu.matmul %10, %1, %cst_12 {dimension_numbers = #tpu.dot_dimension_numbers<[1], [0], [0], [1], [0, 0, 1, 1], [], []>} : vector<8x32xf32>, vector<32x128xf32>, vector<8x128xf32> -> vector<8x128xf32>
    %c0_13 = arith.constant 0 : index
    %c0_14 = arith.constant 0 : index
    %13 = vector.load %arg2[%c0_13, %c0_14] : memref<8x32xf32, #tpu.memory_space<vmem>>, vector<8x32xf32>
    %c0_15 = arith.constant 0 : index
    %c0_16 = arith.constant 0 : index
    %14 = vector.load %arg7[%c0_15, %c0_16] : memref<32x128xf32, #tpu.memory_space<vmem>>, vector<32x128xf32>
    %cst_17 = arith.constant dense<0.000000e+00> : vector<8x128xf32>
    %15 = tpu.matmul %13, %14, %cst_17 {dimension_numbers = #tpu.dot_dimension_numbers<[1], [0], [0], [1], [0, 0, 1, 1], [], []>} : vector<8x32xf32>, vector<32x128xf32>, vector<8x128xf32> -> vector<8x128xf32>
    %16 = arith.addf %12, %15 : vector<8x128xf32>
    %c0_18 = arith.constant 0 : index
    %c0_19 = arith.constant 0 : index
    %17 = vector.load %arg4[%c0_18, %c0_19] : memref<8x32xf32, #tpu.memory_space<vmem>>, vector<8x32xf32>
    %c0_20 = arith.constant 0 : index
    %c0_21 = arith.constant 0 : index
    %18 = vector.load %arg8[%c0_20, %c0_21] : memref<32x128xf32, #tpu.memory_space<vmem>>, vector<32x128xf32>
    %cst_22 = arith.constant dense<0.000000e+00> : vector<8x128xf32>
    %19 = tpu.matmul %17, %18, %cst_22 {dimension_numbers = #tpu.dot_dimension_numbers<[1], [0], [0], [1], [0, 0, 1, 1], [], []>} : vector<8x32xf32>, vector<32x128xf32>, vector<8x128xf32> -> vector<8x128xf32>
    %20 = arith.addf %16, %19 : vector<8x128xf32>
    %21 = arith.addf %20, %5 : vector<8x128xf32>
    %22 = vector.extract_strided_slice %21 {offsets = [0, 0], sizes = [8, 32], strides = [1, 1]} : vector<8x128xf32> to vector<8x32xf32>
    %23 = arith.negf %22 : vector<8x32xf32>
    %24 = math.exp %23 : vector<8x32xf32>
    %cst_23 = arith.constant 1.000000e+00 : f32
    %25 = vector.broadcast %cst_23 : f32 to vector<8x32xf32>
    %26 = arith.addf %25, %24 : vector<8x32xf32>
    %27 = arith.divf %25, %26 : vector<8x32xf32>
    %28 = vector.extract_strided_slice %21 {offsets = [0, 32], sizes = [8, 32], strides = [1, 1]} : vector<8x128xf32> to vector<8x32xf32>
    %29 = arith.negf %28 : vector<8x32xf32>
    %30 = math.exp %29 : vector<8x32xf32>
    %cst_24 = arith.constant 1.000000e+00 : f32
    %31 = vector.broadcast %cst_24 : f32 to vector<8x32xf32>
    %32 = arith.addf %31, %30 : vector<8x32xf32>
    %33 = arith.divf %31, %32 : vector<8x32xf32>
    %34 = vector.extract_strided_slice %21 {offsets = [0, 64], sizes = [8, 32], strides = [1, 1]} : vector<8x128xf32> to vector<8x32xf32>
    %35 = arith.negf %34 : vector<8x32xf32>
    %36 = math.exp %35 : vector<8x32xf32>
    %cst_25 = arith.constant 1.000000e+00 : f32
    %37 = vector.broadcast %cst_25 : f32 to vector<8x32xf32>
    %38 = arith.addf %37, %36 : vector<8x32xf32>
    %39 = arith.divf %37, %38 : vector<8x32xf32>
    %40 = vector.extract_strided_slice %21 {offsets = [0, 96], sizes = [8, 32], strides = [1, 1]} : vector<8x128xf32> to vector<8x32xf32>
    %41 = math.tanh %40 : vector<8x32xf32>
    %c0_26 = arith.constant 0 : index
    %c0_27 = arith.constant 0 : index
    %42 = vector.load %arg3[%c0_26, %c0_27] : memref<8x32xf32, #tpu.memory_space<vmem>>, vector<8x32xf32>
    %43 = arith.mulf %42, %8 : vector<8x32xf32>
    %44 = arith.mulf %27, %43 : vector<8x32xf32>
    %45 = arith.mulf %33, %41 : vector<8x32xf32>
    %46 = arith.addf %44, %45 : vector<8x32xf32>
    %47 = math.tanh %46 : vector<8x32xf32>
    %48 = arith.mulf %39, %47 : vector<8x32xf32>
    %c0_28 = arith.constant 0 : index
    %c0_29 = arith.constant 0 : index
    %c0_30 = arith.constant 0 : index
    %49 = vector.load %arg12[%c0_28, %c0_29, %c0_30] : memref<6x8x96xf32, #tpu.memory_space<vmem>>, vector<1x8x96xf32>
    %50 = vector.shape_cast %49 : vector<1x8x96xf32> to vector<8x96xf32>
    %51 = vector.shape_cast %11 : vector<8x96xf32> to vector<1x8x96xf32>
    tpu.vector_store %arg12[%c0_28, %c0_29, %c0_30], %51 {strides = array<i32>} : memref<6x8x96xf32, #tpu.memory_space<vmem>>, vector<1x8x96xf32>,
    %c0_31 = arith.constant 0 : index
    %c0_32 = arith.constant 0 : index
    %c0_33 = arith.constant 0 : index
    %52 = vector.load %arg13[%c0_31, %c0_32, %c0_33] : memref<6x8x32xf32, #tpu.memory_space<vmem>>, vector<1x8x32xf32>
    %53 = vector.shape_cast %52 : vector<1x8x32xf32> to vector<8x32xf32>
    %54 = vector.shape_cast %48 : vector<8x32xf32> to vector<1x8x32xf32>
    tpu.vector_store %arg13[%c0_31, %c0_32, %c0_33], %54 {strides = array<i32>} : memref<6x8x32xf32, #tpu.memory_space<vmem>>, vector<1x8x32xf32>,
    %c0_34 = arith.constant 0 : index
    %c0_35 = arith.constant 0 : index
    %c0_36 = arith.constant 0 : index
    %55 = vector.load %arg14[%c0_34, %c0_35, %c0_36] : memref<6x8x32xf32, #tpu.memory_space<vmem>>, vector<1x8x32xf32>
    %56 = vector.shape_cast %55 : vector<1x8x32xf32> to vector<8x32xf32>
    %57 = vector.shape_cast %46 : vector<8x32xf32> to vector<1x8x32xf32>
    tpu.vector_store %arg14[%c0_34, %c0_35, %c0_36], %57 {strides = array<i32>} : memref<6x8x32xf32, #tpu.memory_space<vmem>>, vector<1x8x32xf32>,
    %c1_i32 = arith.constant 1 : i32
    %58 = arith.index_cast %c1_i32 : i32 to index
    %c0_37 = arith.constant 0 : index
    %c0_38 = arith.constant 0 : index
    %59 = vector.load %arg1[%58, %c0_37, %c0_38] : memref<6x8x32xf32, #tpu.memory_space<vmem>>, vector<1x8x32xf32>
    %60 = vector.shape_cast %59 : vector<1x8x32xf32> to vector<8x32xf32>
    %cst_39 = arith.constant dense<0.000000e+00> : vector<8x96xf32>
    %61 = tpu.matmul %60, %0, %cst_39 {dimension_numbers = #tpu.dot_dimension_numbers<[1], [0], [0], [1], [0, 0, 1, 1], [], []>} : vector<8x32xf32>, vector<32x96xf32>, vector<8x96xf32> -> vector<8x96xf32>
    %cst_40 = arith.constant dense<0.000000e+00> : vector<8x128xf32>
    %62 = tpu.matmul %60, %1, %cst_40 {dimension_numbers = #tpu.dot_dimension_numbers<[1], [0], [0], [1], [0, 0, 1, 1], [], []>} : vector<8x32xf32>, vector<32x128xf32>, vector<8x128xf32> -> vector<8x128xf32>
    %cst_41 = arith.constant dense<0.000000e+00> : vector<8x128xf32>
    %63 = tpu.matmul %48, %2, %cst_41 {dimension_numbers = #tpu.dot_dimension_numbers<[1], [0], [0], [1], [0, 0, 1, 1], [], []>} : vector<8x32xf32>, vector<32x128xf32>, vector<8x128xf32> -> vector<8x128xf32>
    %64 = arith.addf %62, %63 : vector<8x128xf32>
    %65 = arith.addf %64, %5 : vector<8x128xf32>
    %66 = vector.extract_strided_slice %65 {offsets = [0, 0], sizes = [8, 32], strides = [1, 1]} : vector<8x128xf32> to vector<8x32xf32>
    %67 = arith.negf %66 : vector<8x32xf32>
    %68 = math.exp %67 : vector<8x32xf32>
    %cst_42 = arith.constant 1.000000e+00 : f32
    %69 = vector.broadcast %cst_42 : f32 to vector<8x32xf32>
    %70 = arith.addf %69, %68 : vector<8x32xf32>
    %71 = arith.divf %69, %70 : vector<8x32xf32>
    %72 = vector.extract_strided_slice %65 {offsets = [0, 32], sizes = [8, 32], strides = [1, 1]} : vector<8x128xf32> to vector<8x32xf32>
    %73 = arith.negf %72 : vector<8x32xf32>
    %74 = math.exp %73 : vector<8x32xf32>
    %cst_43 = arith.constant 1.000000e+00 : f32
    %75 = vector.broadcast %cst_43 : f32 to vector<8x32xf32>
    %76 = arith.addf %75, %74 : vector<8x32xf32>
    %77 = arith.divf %75, %76 : vector<8x32xf32>
    %78 = vector.extract_strided_slice %65 {offsets = [0, 64], sizes = [8, 32], strides = [1, 1]} : vector<8x128xf32> to vector<8x32xf32>
    %79 = arith.negf %78 : vector<8x32xf32>
    %80 = math.exp %79 : vector<8x32xf32>
    %cst_44 = arith.constant 1.000000e+00 : f32
    %81 = vector.broadcast %cst_44 : f32 to vector<8x32xf32>
    %82 = arith.addf %81, %80 : vector<8x32xf32>
    %83 = arith.divf %81, %82 : vector<8x32xf32>
    %84 = vector.extract_strided_slice %65 {offsets = [0, 96], sizes = [8, 32], strides = [1, 1]} : vector<8x128xf32> to vector<8x32xf32>
    %85 = math.tanh %84 : vector<8x32xf32>
    %86 = arith.mulf %46, %8 : vector<8x32xf32>
    %87 = arith.mulf %71, %86 : vector<8x32xf32>
    %88 = arith.mulf %77, %85 : vector<8x32xf32>
    %89 = arith.addf %87, %88 : vector<8x32xf32>
    %90 = math.tanh %89 : vector<8x32xf32>
    %91 = arith.mulf %83, %90 : vector<8x32xf32>
    %92 = arith.index_cast %c1_i32 : i32 to index
    %c0_45 = arith.constant 0 : index
    %c0_46 = arith.constant 0 : index
    %93 = vector.load %arg12[%92, %c0_45, %c0_46] : memref<6x8x96xf32, #tpu.memory_space<vmem>>, vector<1x8x96xf32>
    %94 = vector.shape_cast %93 : vector<1x8x96xf32> to vector<8x96xf32>
    %95 = vector.shape_cast %61 : vector<8x96xf32> to vector<1x8x96xf32>
    tpu.vector_store %arg12[%92, %c0_45, %c0_46], %95 {strides = array<i32>} : memref<6x8x96xf32, #tpu.memory_space<vmem>>, vector<1x8x96xf32>,
    %96 = arith.index_cast %c1_i32 : i32 to index
    %c0_47 = arith.constant 0 : index
    %c0_48 = arith.constant 0 : index
    %97 = vector.load %arg13[%96, %c0_47, %c0_48] : memref<6x8x32xf32, #tpu.memory_space<vmem>>, vector<1x8x32xf32>
    %98 = vector.shape_cast %97 : vector<1x8x32xf32> to vector<8x32xf32>
    %99 = vector.shape_cast %91 : vector<8x32xf32> to vector<1x8x32xf32>
    tpu.vector_store %arg13[%96, %c0_47, %c0_48], %99 {strides = array<i32>} : memref<6x8x32xf32, #tpu.memory_space<vmem>>, vector<1x8x32xf32>,
    %100 = arith.index_cast %c1_i32 : i32 to index
    %c0_49 = arith.constant 0 : index
    %c0_50 = arith.constant 0 : index
    %101 = vector.load %arg14[%100, %c0_49, %c0_50] : memref<6x8x32xf32, #tpu.memory_space<vmem>>, vector<1x8x32xf32>
    %102 = vector.shape_cast %101 : vector<1x8x32xf32> to vector<8x32xf32>
    %103 = vector.shape_cast %89 : vector<8x32xf32> to vector<1x8x32xf32>
    tpu.vector_store %arg14[%100, %c0_49, %c0_50], %103 {strides = array<i32>} : memref<6x8x32xf32, #tpu.memory_space<vmem>>, vector<1x8x32xf32>,
    %c2_i32 = arith.constant 2 : i32
    %104 = arith.index_cast %c2_i32 : i32 to index
    %c0_51 = arith.constant 0 : index
    %c0_52 = arith.constant 0 : index
    %105 = vector.load %arg1[%104, %c0_51, %c0_52] : memref<6x8x32xf32, #tpu.memory_space<vmem>>, vector<1x8x32xf32>
    %106 = vector.shape_cast %105 : vector<1x8x32xf32> to vector<8x32xf32>
    %cst_53 = arith.constant dense<0.000000e+00> : vector<8x96xf32>
    %107 = tpu.matmul %106, %0, %cst_53 {dimension_numbers = #tpu.dot_dimension_numbers<[1], [0], [0], [1], [0, 0, 1, 1], [], []>} : vector<8x32xf32>, vector<32x96xf32>, vector<8x96xf32> -> vector<8x96xf32>
    %cst_54 = arith.constant dense<0.000000e+00> : vector<8x128xf32>
    %108 = tpu.matmul %106, %1, %cst_54 {dimension_numbers = #tpu.dot_dimension_numbers<[1], [0], [0], [1], [0, 0, 1, 1], [], []>} : vector<8x32xf32>, vector<32x128xf32>, vector<8x128xf32> -> vector<8x128xf32>
    %cst_55 = arith.constant dense<0.000000e+00> : vector<8x128xf32>
    %109 = tpu.matmul %91, %2, %cst_55 {dimension_numbers = #tpu.dot_dimension_numbers<[1], [0], [0], [1], [0, 0, 1, 1], [], []>} : vector<8x32xf32>, vector<32x128xf32>, vector<8x128xf32> -> vector<8x128xf32>
    %110 = arith.addf %108, %109 : vector<8x128xf32>
    %111 = arith.addf %110, %5 : vector<8x128xf32>
    %112 = vector.extract_strided_slice %111 {offsets = [0, 0], sizes = [8, 32], strides = [1, 1]} : vector<8x128xf32> to vector<8x32xf32>
    %113 = arith.negf %112 : vector<8x32xf32>
    %114 = math.exp %113 : vector<8x32xf32>
    %cst_56 = arith.constant 1.000000e+00 : f32
    %115 = vector.broadcast %cst_56 : f32 to vector<8x32xf32>
    %116 = arith.addf %115, %114 : vector<8x32xf32>
    %117 = arith.divf %115, %116 : vector<8x32xf32>
    %118 = vector.extract_strided_slice %111 {offsets = [0, 32], sizes = [8, 32], strides = [1, 1]} : vector<8x128xf32> to vector<8x32xf32>
    %119 = arith.negf %118 : vector<8x32xf32>
    %120 = math.exp %119 : vector<8x32xf32>
    %cst_57 = arith.constant 1.000000e+00 : f32
    %121 = vector.broadcast %cst_57 : f32 to vector<8x32xf32>
    %122 = arith.addf %121, %120 : vector<8x32xf32>
    %123 = arith.divf %121, %122 : vector<8x32xf32>
    %124 = vector.extract_strided_slice %111 {offsets = [0, 64], sizes = [8, 32], strides = [1, 1]} : vector<8x128xf32> to vector<8x32xf32>
    %125 = arith.negf %124 : vector<8x32xf32>
    %126 = math.exp %125 : vector<8x32xf32>
    %cst_58 = arith.constant 1.000000e+00 : f32
    %127 = vector.broadcast %cst_58 : f32 to vector<8x32xf32>
    %128 = arith.addf %127, %126 : vector<8x32xf32>
    %129 = arith.divf %127, %128 : vector<8x32xf32>
    %130 = vector.extract_strided_slice %111 {offsets = [0, 96], sizes = [8, 32], strides = [1, 1]} : vector<8x128xf32> to vector<8x32xf32>
    %131 = math.tanh %130 : vector<8x32xf32>
    %132 = arith.mulf %89, %8 : vector<8x32xf32>
    %133 = arith.mulf %117, %132 : vector<8x32xf32>
    %134 = arith.mulf %123, %131 : vector<8x32xf32>
    %135 = arith.addf %133, %134 : vector<8x32xf32>
    %136 = math.tanh %135 : vector<8x32xf32>
    %137 = arith.mulf %129, %136 : vector<8x32xf32>
    %138 = arith.index_cast %c2_i32 : i32 to index
    %c0_59 = arith.constant 0 : index
    %c0_60 = arith.constant 0 : index
    %139 = vector.load %arg12[%138, %c0_59, %c0_60] : memref<6x8x96xf32, #tpu.memory_space<vmem>>, vector<1x8x96xf32>
    %140 = vector.shape_cast %139 : vector<1x8x96xf32> to vector<8x96xf32>
    %141 = vector.shape_cast %107 : vector<8x96xf32> to vector<1x8x96xf32>
    tpu.vector_store %arg12[%138, %c0_59, %c0_60], %141 {strides = array<i32>} : memref<6x8x96xf32, #tpu.memory_space<vmem>>, vector<1x8x96xf32>,
    %142 = arith.index_cast %c2_i32 : i32 to index
    %c0_61 = arith.constant 0 : index
    %c0_62 = arith.constant 0 : index
    %143 = vector.load %arg13[%142, %c0_61, %c0_62] : memref<6x8x32xf32, #tpu.memory_space<vmem>>, vector<1x8x32xf32>
    %144 = vector.shape_cast %143 : vector<1x8x32xf32> to vector<8x32xf32>
    %145 = vector.shape_cast %137 : vector<8x32xf32> to vector<1x8x32xf32>
    tpu.vector_store %arg13[%142, %c0_61, %c0_62], %145 {strides = array<i32>} : memref<6x8x32xf32, #tpu.memory_space<vmem>>, vector<1x8x32xf32>,
    %146 = arith.index_cast %c2_i32 : i32 to index
    %c0_63 = arith.constant 0 : index
    %c0_64 = arith.constant 0 : index
    %147 = vector.load %arg14[%146, %c0_63, %c0_64] : memref<6x8x32xf32, #tpu.memory_space<vmem>>, vector<1x8x32xf32>
    %148 = vector.shape_cast %147 : vector<1x8x32xf32> to vector<8x32xf32>
    %149 = vector.shape_cast %135 : vector<8x32xf32> to vector<1x8x32xf32>
    tpu.vector_store %arg14[%146, %c0_63, %c0_64], %149 {strides = array<i32>} : memref<6x8x32xf32, #tpu.memory_space<vmem>>, vector<1x8x32xf32>,
    %c3_i32 = arith.constant 3 : i32
    %150 = arith.index_cast %c3_i32 : i32 to index
    %c0_65 = arith.constant 0 : index
    %c0_66 = arith.constant 0 : index
    %151 = vector.load %arg1[%150, %c0_65, %c0_66] : memref<6x8x32xf32, #tpu.memory_space<vmem>>, vector<1x8x32xf32>
    %152 = vector.shape_cast %151 : vector<1x8x32xf32> to vector<8x32xf32>
    %cst_67 = arith.constant dense<0.000000e+00> : vector<8x96xf32>
    %153 = tpu.matmul %152, %0, %cst_67 {dimension_numbers = #tpu.dot_dimension_numbers<[1], [0], [0], [1], [0, 0, 1, 1], [], []>} : vector<8x32xf32>, vector<32x96xf32>, vector<8x96xf32> -> vector<8x96xf32>
    %cst_68 = arith.constant dense<0.000000e+00> : vector<8x128xf32>
    %154 = tpu.matmul %152, %1, %cst_68 {dimension_numbers = #tpu.dot_dimension_numbers<[1], [0], [0], [1], [0, 0, 1, 1], [], []>} : vector<8x32xf32>, vector<32x128xf32>, vector<8x128xf32> -> vector<8x128xf32>
    %cst_69 = arith.constant dense<0.000000e+00> : vector<8x128xf32>
    %155 = tpu.matmul %137, %2, %cst_69 {dimension_numbers = #tpu.dot_dimension_numbers<[1], [0], [0], [1], [0, 0, 1, 1], [], []>} : vector<8x32xf32>, vector<32x128xf32>, vector<8x128xf32> -> vector<8x128xf32>
    %156 = arith.addf %154, %155 : vector<8x128xf32>
    %157 = arith.addf %156, %5 : vector<8x128xf32>
    %158 = vector.extract_strided_slice %157 {offsets = [0, 0], sizes = [8, 32], strides = [1, 1]} : vector<8x128xf32> to vector<8x32xf32>
    %159 = arith.negf %158 : vector<8x32xf32>
    %160 = math.exp %159 : vector<8x32xf32>
    %cst_70 = arith.constant 1.000000e+00 : f32
    %161 = vector.broadcast %cst_70 : f32 to vector<8x32xf32>
    %162 = arith.addf %161, %160 : vector<8x32xf32>
    %163 = arith.divf %161, %162 : vector<8x32xf32>
    %164 = vector.extract_strided_slice %157 {offsets = [0, 32], sizes = [8, 32], strides = [1, 1]} : vector<8x128xf32> to vector<8x32xf32>
    %165 = arith.negf %164 : vector<8x32xf32>
    %166 = math.exp %165 : vector<8x32xf32>
    %cst_71 = arith.constant 1.000000e+00 : f32
    %167 = vector.broadcast %cst_71 : f32 to vector<8x32xf32>
    %168 = arith.addf %167, %166 : vector<8x32xf32>
    %169 = arith.divf %167, %168 : vector<8x32xf32>
    %170 = vector.extract_strided_slice %157 {offsets = [0, 64], sizes = [8, 32], strides = [1, 1]} : vector<8x128xf32> to vector<8x32xf32>
    %171 = arith.negf %170 : vector<8x32xf32>
    %172 = math.exp %171 : vector<8x32xf32>
    %cst_72 = arith.constant 1.000000e+00 : f32
    %173 = vector.broadcast %cst_72 : f32 to vector<8x32xf32>
    %174 = arith.addf %173, %172 : vector<8x32xf32>
    %175 = arith.divf %173, %174 : vector<8x32xf32>
    %176 = vector.extract_strided_slice %157 {offsets = [0, 96], sizes = [8, 32], strides = [1, 1]} : vector<8x128xf32> to vector<8x32xf32>
    %177 = math.tanh %176 : vector<8x32xf32>
    %178 = arith.mulf %135, %8 : vector<8x32xf32>
    %179 = arith.mulf %163, %178 : vector<8x32xf32>
    %180 = arith.mulf %169, %177 : vector<8x32xf32>
    %181 = arith.addf %179, %180 : vector<8x32xf32>
    %182 = math.tanh %181 : vector<8x32xf32>
    %183 = arith.mulf %175, %182 : vector<8x32xf32>
    %184 = arith.index_cast %c3_i32 : i32 to index
    %c0_73 = arith.constant 0 : index
    %c0_74 = arith.constant 0 : index
    %185 = vector.load %arg12[%184, %c0_73, %c0_74] : memref<6x8x96xf32, #tpu.memory_space<vmem>>, vector<1x8x96xf32>
    %186 = vector.shape_cast %185 : vector<1x8x96xf32> to vector<8x96xf32>
    %187 = vector.shape_cast %153 : vector<8x96xf32> to vector<1x8x96xf32>
    tpu.vector_store %arg12[%184, %c0_73, %c0_74], %187 {strides = array<i32>} : memref<6x8x96xf32, #tpu.memory_space<vmem>>, vector<1x8x96xf32>,
    %188 = arith.index_cast %c3_i32 : i32 to index
    %c0_75 = arith.constant 0 : index
    %c0_76 = arith.constant 0 : index
    %189 = vector.load %arg13[%188, %c0_75, %c0_76] : memref<6x8x32xf32, #tpu.memory_space<vmem>>, vector<1x8x32xf32>
    %190 = vector.shape_cast %189 : vector<1x8x32xf32> to vector<8x32xf32>
    %191 = vector.shape_cast %183 : vector<8x32xf32> to vector<1x8x32xf32>
    tpu.vector_store %arg13[%188, %c0_75, %c0_76], %191 {strides = array<i32>} : memref<6x8x32xf32, #tpu.memory_space<vmem>>, vector<1x8x32xf32>,
    %192 = arith.index_cast %c3_i32 : i32 to index
    %c0_77 = arith.constant 0 : index
    %c0_78 = arith.constant 0 : index
    %193 = vector.load %arg14[%192, %c0_77, %c0_78] : memref<6x8x32xf32, #tpu.memory_space<vmem>>, vector<1x8x32xf32>
    %194 = vector.shape_cast %193 : vector<1x8x32xf32> to vector<8x32xf32>
    %195 = vector.shape_cast %181 : vector<8x32xf32> to vector<1x8x32xf32>
    tpu.vector_store %arg14[%192, %c0_77, %c0_78], %195 {strides = array<i32>} : memref<6x8x32xf32, #tpu.memory_space<vmem>>, vector<1x8x32xf32>,
    %c4_i32 = arith.constant 4 : i32
    %196 = arith.index_cast %c4_i32 : i32 to index
    %c0_79 = arith.constant 0 : index
    %c0_80 = arith.constant 0 : index
    %197 = vector.load %arg1[%196, %c0_79, %c0_80] : memref<6x8x32xf32, #tpu.memory_space<vmem>>, vector<1x8x32xf32>
    %198 = vector.shape_cast %197 : vector<1x8x32xf32> to vector<8x32xf32>
    %cst_81 = arith.constant dense<0.000000e+00> : vector<8x96xf32>
    %199 = tpu.matmul %198, %0, %cst_81 {dimension_numbers = #tpu.dot_dimension_numbers<[1], [0], [0], [1], [0, 0, 1, 1], [], []>} : vector<8x32xf32>, vector<32x96xf32>, vector<8x96xf32> -> vector<8x96xf32>
    %cst_82 = arith.constant dense<0.000000e+00> : vector<8x128xf32>
    %200 = tpu.matmul %198, %1, %cst_82 {dimension_numbers = #tpu.dot_dimension_numbers<[1], [0], [0], [1], [0, 0, 1, 1], [], []>} : vector<8x32xf32>, vector<32x128xf32>, vector<8x128xf32> -> vector<8x128xf32>
    %cst_83 = arith.constant dense<0.000000e+00> : vector<8x128xf32>
    %201 = tpu.matmul %183, %2, %cst_83 {dimension_numbers = #tpu.dot_dimension_numbers<[1], [0], [0], [1], [0, 0, 1, 1], [], []>} : vector<8x32xf32>, vector<32x128xf32>, vector<8x128xf32> -> vector<8x128xf32>
    %202 = arith.addf %200, %201 : vector<8x128xf32>
    %203 = arith.addf %202, %5 : vector<8x128xf32>
    %204 = vector.extract_strided_slice %203 {offsets = [0, 0], sizes = [8, 32], strides = [1, 1]} : vector<8x128xf32> to vector<8x32xf32>
    %205 = arith.negf %204 : vector<8x32xf32>
    %206 = math.exp %205 : vector<8x32xf32>
    %cst_84 = arith.constant 1.000000e+00 : f32
    %207 = vector.broadcast %cst_84 : f32 to vector<8x32xf32>
    %208 = arith.addf %207, %206 : vector<8x32xf32>
    %209 = arith.divf %207, %208 : vector<8x32xf32>
    %210 = vector.extract_strided_slice %203 {offsets = [0, 32], sizes = [8, 32], strides = [1, 1]} : vector<8x128xf32> to vector<8x32xf32>
    %211 = arith.negf %210 : vector<8x32xf32>
    %212 = math.exp %211 : vector<8x32xf32>
    %cst_85 = arith.constant 1.000000e+00 : f32
    %213 = vector.broadcast %cst_85 : f32 to vector<8x32xf32>
    %214 = arith.addf %213, %212 : vector<8x32xf32>
    %215 = arith.divf %213, %214 : vector<8x32xf32>
    %216 = vector.extract_strided_slice %203 {offsets = [0, 64], sizes = [8, 32], strides = [1, 1]} : vector<8x128xf32> to vector<8x32xf32>
    %217 = arith.negf %216 : vector<8x32xf32>
    %218 = math.exp %217 : vector<8x32xf32>
    %cst_86 = arith.constant 1.000000e+00 : f32
    %219 = vector.broadcast %cst_86 : f32 to vector<8x32xf32>
    %220 = arith.addf %219, %218 : vector<8x32xf32>
    %221 = arith.divf %219, %220 : vector<8x32xf32>
    %222 = vector.extract_strided_slice %203 {offsets = [0, 96], sizes = [8, 32], strides = [1, 1]} : vector<8x128xf32> to vector<8x32xf32>
    %223 = math.tanh %222 : vector<8x32xf32>
    %224 = arith.mulf %181, %8 : vector<8x32xf32>
    %225 = arith.mulf %209, %224 : vector<8x32xf32>
    %226 = arith.mulf %215, %223 : vector<8x32xf32>
    %227 = arith.addf %225, %226 : vector<8x32xf32>
    %228 = math.tanh %227 : vector<8x32xf32>
    %229 = arith.mulf %221, %228 : vector<8x32xf32>
    %230 = arith.index_cast %c4_i32 : i32 to index
    %c0_87 = arith.constant 0 : index
    %c0_88 = arith.constant 0 : index
    %231 = vector.load %arg12[%230, %c0_87, %c0_88] : memref<6x8x96xf32, #tpu.memory_space<vmem>>, vector<1x8x96xf32>
    %232 = vector.shape_cast %231 : vector<1x8x96xf32> to vector<8x96xf32>
    %233 = vector.shape_cast %199 : vector<8x96xf32> to vector<1x8x96xf32>
    tpu.vector_store %arg12[%230, %c0_87, %c0_88], %233 {strides = array<i32>} : memref<6x8x96xf32, #tpu.memory_space<vmem>>, vector<1x8x96xf32>,
    %234 = arith.index_cast %c4_i32 : i32 to index
    %c0_89 = arith.constant 0 : index
    %c0_90 = arith.constant 0 : index
    %235 = vector.load %arg13[%234, %c0_89, %c0_90] : memref<6x8x32xf32, #tpu.memory_space<vmem>>, vector<1x8x32xf32>
    %236 = vector.shape_cast %235 : vector<1x8x32xf32> to vector<8x32xf32>
    %237 = vector.shape_cast %229 : vector<8x32xf32> to vector<1x8x32xf32>
    tpu.vector_store %arg13[%234, %c0_89, %c0_90], %237 {strides = array<i32>} : memref<6x8x32xf32, #tpu.memory_space<vmem>>, vector<1x8x32xf32>,
    %238 = arith.index_cast %c4_i32 : i32 to index
    %c0_91 = arith.constant 0 : index
    %c0_92 = arith.constant 0 : index
    %239 = vector.load %arg14[%238, %c0_91, %c0_92] : memref<6x8x32xf32, #tpu.memory_space<vmem>>, vector<1x8x32xf32>
    %240 = vector.shape_cast %239 : vector<1x8x32xf32> to vector<8x32xf32>
    %241 = vector.shape_cast %227 : vector<8x32xf32> to vector<1x8x32xf32>
    tpu.vector_store %arg14[%238, %c0_91, %c0_92], %241 {strides = array<i32>} : memref<6x8x32xf32, #tpu.memory_space<vmem>>, vector<1x8x32xf32>,
    %c5_i32 = arith.constant 5 : i32
    %242 = arith.index_cast %c5_i32 : i32 to index
    %c0_93 = arith.constant 0 : index
    %c0_94 = arith.constant 0 : index
    %243 = vector.load %arg1[%242, %c0_93, %c0_94] : memref<6x8x32xf32, #tpu.memory_space<vmem>>, vector<1x8x32xf32>
    %244 = vector.shape_cast %243 : vector<1x8x32xf32> to vector<8x32xf32>
    %cst_95 = arith.constant dense<0.000000e+00> : vector<8x96xf32>
    %245 = tpu.matmul %244, %0, %cst_95 {dimension_numbers = #tpu.dot_dimension_numbers<[1], [0], [0], [1], [0, 0, 1, 1], [], []>} : vector<8x32xf32>, vector<32x96xf32>, vector<8x96xf32> -> vector<8x96xf32>
    %cst_96 = arith.constant dense<0.000000e+00> : vector<8x128xf32>
    %246 = tpu.matmul %244, %1, %cst_96 {dimension_numbers = #tpu.dot_dimension_numbers<[1], [0], [0], [1], [0, 0, 1, 1], [], []>} : vector<8x32xf32>, vector<32x128xf32>, vector<8x128xf32> -> vector<8x128xf32>
    %cst_97 = arith.constant dense<0.000000e+00> : vector<8x128xf32>
    %247 = tpu.matmul %229, %2, %cst_97 {dimension_numbers = #tpu.dot_dimension_numbers<[1], [0], [0], [1], [0, 0, 1, 1], [], []>} : vector<8x32xf32>, vector<32x128xf32>, vector<8x128xf32> -> vector<8x128xf32>
    %248 = arith.addf %246, %247 : vector<8x128xf32>
    %249 = arith.addf %248, %5 : vector<8x128xf32>
    %250 = vector.extract_strided_slice %249 {offsets = [0, 0], sizes = [8, 32], strides = [1, 1]} : vector<8x128xf32> to vector<8x32xf32>
    %251 = arith.negf %250 : vector<8x32xf32>
    %252 = math.exp %251 : vector<8x32xf32>
    %cst_98 = arith.constant 1.000000e+00 : f32
    %253 = vector.broadcast %cst_98 : f32 to vector<8x32xf32>
    %254 = arith.addf %253, %252 : vector<8x32xf32>
    %255 = arith.divf %253, %254 : vector<8x32xf32>
    %256 = vector.extract_strided_slice %249 {offsets = [0, 32], sizes = [8, 32], strides = [1, 1]} : vector<8x128xf32> to vector<8x32xf32>
    %257 = arith.negf %256 : vector<8x32xf32>
    %258 = math.exp %257 : vector<8x32xf32>
    %cst_99 = arith.constant 1.000000e+00 : f32
    %259 = vector.broadcast %cst_99 : f32 to vector<8x32xf32>
    %260 = arith.addf %259, %258 : vector<8x32xf32>
    %261 = arith.divf %259, %260 : vector<8x32xf32>
    %262 = vector.extract_strided_slice %249 {offsets = [0, 64], sizes = [8, 32], strides = [1, 1]} : vector<8x128xf32> to vector<8x32xf32>
    %263 = arith.negf %262 : vector<8x32xf32>
    %264 = math.exp %263 : vector<8x32xf32>
    %cst_100 = arith.constant 1.000000e+00 : f32
    %265 = vector.broadcast %cst_100 : f32 to vector<8x32xf32>
    %266 = arith.addf %265, %264 : vector<8x32xf32>
    %267 = arith.divf %265, %266 : vector<8x32xf32>
    %268 = vector.extract_strided_slice %249 {offsets = [0, 96], sizes = [8, 32], strides = [1, 1]} : vector<8x128xf32> to vector<8x32xf32>
    %269 = math.tanh %268 : vector<8x32xf32>
    %270 = arith.mulf %227, %8 : vector<8x32xf32>
    %271 = arith.mulf %255, %270 : vector<8x32xf32>
    %272 = arith.mulf %261, %269 : vector<8x32xf32>
    %273 = arith.addf %271, %272 : vector<8x32xf32>
    %274 = math.tanh %273 : vector<8x32xf32>
    %275 = arith.mulf %267, %274 : vector<8x32xf32>
    %276 = arith.index_cast %c5_i32 : i32 to index
    %c0_101 = arith.constant 0 : index
    %c0_102 = arith.constant 0 : index
    %277 = vector.load %arg12[%276, %c0_101, %c0_102] : memref<6x8x96xf32, #tpu.memory_space<vmem>>, vector<1x8x96xf32>
    %278 = vector.shape_cast %277 : vector<1x8x96xf32> to vector<8x96xf32>
    %279 = vector.shape_cast %245 : vector<8x96xf32> to vector<1x8x96xf32>
    tpu.vector_store %arg12[%276, %c0_101, %c0_102], %279 {strides = array<i32>} : memref<6x8x96xf32, #tpu.memory_space<vmem>>, vector<1x8x96xf32>,
    %280 = arith.index_cast %c5_i32 : i32 to index
    %c0_103 = arith.constant 0 : index
    %c0_104 = arith.constant 0 : index
    %281 = vector.load %arg13[%280, %c0_103, %c0_104] : memref<6x8x32xf32, #tpu.memory_space<vmem>>, vector<1x8x32xf32>
    %282 = vector.shape_cast %281 : vector<1x8x32xf32> to vector<8x32xf32>
    %283 = vector.shape_cast %275 : vector<8x32xf32> to vector<1x8x32xf32>
    tpu.vector_store %arg13[%280, %c0_103, %c0_104], %283 {strides = array<i32>} : memref<6x8x32xf32, #tpu.memory_space<vmem>>, vector<1x8x32xf32>,
    %284 = arith.index_cast %c5_i32 : i32 to index
    %c0_105 = arith.constant 0 : index
    %c0_106 = arith.constant 0 : index
    %285 = vector.load %arg14[%284, %c0_105, %c0_106] : memref<6x8x32xf32, #tpu.memory_space<vmem>>, vector<1x8x32xf32>
    %286 = vector.shape_cast %285 : vector<1x8x32xf32> to vector<8x32xf32>
    %287 = vector.shape_cast %273 : vector<8x32xf32> to vector<1x8x32xf32>
    tpu.vector_store %arg14[%284, %c0_105, %c0_106], %287 {strides = array<i32>} : memref<6x8x32xf32, #tpu.memory_space<vmem>>, vector<1x8x32xf32>,
    %c5_i32_107 = arith.constant 5 : i32
    return
  }
  func.func @transform_0(%arg0: i32) -> (i32, i32, i32) {
    %c0_i32 = arith.constant 0 : i32
    %c0_i32_0 = arith.constant 0 : i32
    %c0_i32_1 = arith.constant 0 : i32
    %c0_i32_2 = arith.constant 0 : i32
    return %c0_i32, %c0_i32_0, %c0_i32_1 : i32, i32, i32
  }
  func.func @transform_1(%arg0: i32) -> (i32, i32) {
    %c0_i32 = arith.constant 0 : i32
    %c0_i32_0 = arith.constant 0 : i32
    %c0_i32_1 = arith.constant 0 : i32
    return %c0_i32, %c0_i32_0 : i32, i32
  }
  func.func @transform_2(%arg0: i32) -> (i32, i32) {
    %c0_i32 = arith.constant 0 : i32
    %c0_i32_0 = arith.constant 0 : i32
    %c0_i32_1 = arith.constant 0 : i32
    return %c0_i32, %c0_i32_0 : i32, i32
  }
  func.func @transform_3(%arg0: i32) -> (i32, i32) {
    %c0_i32 = arith.constant 0 : i32
    %c0_i32_0 = arith.constant 0 : i32
    %c0_i32_1 = arith.constant 0 : i32
    return %c0_i32, %c0_i32_0 : i32, i32
  }
  func.func @transform_4(%arg0: i32) -> (i32, i32) {
    %c0_i32 = arith.constant 0 : i32
    %c0_i32_0 = arith.constant 0 : i32
    %c0_i32_1 = arith.constant 0 : i32
    return %c0_i32, %c0_i32_0 : i32, i32
  }
  func.func @transform_5(%arg0: i32) -> (i32, i32) {
    %c0_i32 = arith.constant 0 : i32
    %c0_i32_0 = arith.constant 0 : i32
    %c0_i32_1 = arith.constant 0 : i32
    return %c0_i32, %c0_i32_0 : i32, i32
  }
  func.func @transform_6(%arg0: i32) -> (i32, i32) {
    %c0_i32 = arith.constant 0 : i32
    %c0_i32_0 = arith.constant 0 : i32
    %c0_i32_1 = arith.constant 0 : i32
    return %c0_i32, %c0_i32_0 : i32, i32
  }
  func.func @transform_7(%arg0: i32) -> (i32, i32) {
    %c0_i32 = arith.constant 0 : i32
    %c0_i32_0 = arith.constant 0 : i32
    %c0_i32_1 = arith.constant 0 : i32
    return %c0_i32, %c0_i32_0 : i32, i32
  }
  func.func @transform_8(%arg0: i32) -> (i32, i32) {
    %c0_i32 = arith.constant 0 : i32
    %c0_i32_0 = arith.constant 0 : i32
    %c0_i32_1 = arith.constant 0 : i32
    return %c0_i32, %c0_i32_0 : i32, i32
  }
  func.func @transform_9(%arg0: i32) -> (i32, i32) {
    %c0_i32 = arith.constant 0 : i32
    %c0_i32_0 = arith.constant 0 : i32
    %c0_i32_1 = arith.constant 0 : i32
    return %c0_i32, %c0_i32_0 : i32, i32
  }
  func.func @transform_10(%arg0: i32) -> (i32, i32) {
    %c0_i32 = arith.constant 0 : i32
    %c0_i32_0 = arith.constant 0 : i32
    %c0_i32_1 = arith.constant 0 : i32
    return %c0_i32, %c0_i32_0 : i32, i32
  }
  func.func @transform_11(%arg0: i32) -> (i32, i32, i32) {
    %c0_i32 = arith.constant 0 : i32
    %c0_i32_0 = arith.constant 0 : i32
    %c0_i32_1 = arith.constant 0 : i32
    %c0_i32_2 = arith.constant 0 : i32
    return %c0_i32, %c0_i32_0, %c0_i32_1 : i32, i32, i32
  }
  func.func @transform_12(%arg0: i32) -> (i32, i32, i32) {
    %c0_i32 = arith.constant 0 : i32
    %c0_i32_0 = arith.constant 0 : i32
    %c0_i32_1 = arith.constant 0 : i32
    %c0_i32_2 = arith.constant 0 : i32
    return %c0_i32, %c0_i32_0, %c0_i32_1 : i32, i32, i32
  }
  func.func @transform_13(%arg0: i32) -> (i32, i32, i32) {
    %c0_i32 = arith.constant 0 : i32
    %c0_i32_0 = arith.constant 0 : i32
    %c0_i32_1 = arith.constant 0 : i32
    %c0_i32_2 = arith.constant 0 : i32
    return %c0_i32, %c0_i32_0, %c0_i32_1 : i32, i32, i32
  }
}

</mosaic_0001>

<bundles_post_ra>
// kernel: ntdsgcn_loop.1
= control target key start
LH: loop header
LB: loop body
LE: loop exit
PB: predicated region body
PF: predicated region fallthrough
CT: control target
= control target key end

     0   :  { %19 = vsyncpa [#allocation3], 0  ;;  %s3030_s0 = inlined_call_operand.hbm [shape: f32[6,8,32], index: 0, kind: input, shape index: {}]   ;;  %s3031_s1 = inlined_call_operand.hbm [shape: f32[8,32], index: 1, kind: input, shape index: {}]   ;;  %s3032_s2 = inlined_call_operand.hbm [shape: f32[8,32], index: 2, kind: input, shape index: {}]   ;;  %s3033_s3 = inlined_call_operand.vmem [shape: f32[8,32], index: 3, kind: input, shape index: {}]   ;;  %s3034_s4 = inlined_call_operand.hbm [shape: f32[32,96], index: 4, kind: input, shape index: {}]   ;;  %s3035_s5 = inlined_call_operand.hbm [shape: f32[32,128], index: 5, kind: input, shape index: {}]   ;;  %s3036_s6 = inlined_call_operand.hbm [shape: f32[32,128], index: 6, kind: input, shape index: {}]   ;;  %s3037_s7 = inlined_call_operand.hbm [shape: f32[32,128], index: 7, kind: input, shape index: {}]   ;;  %s3038_s8 = inlined_call_operand.hbm [shape: f32[32,128], index: 8, kind: input, shape index: {}]   ;;  %s3039_s9 = inlined_call_operand.vmem [shape: f32[1,128], index: 9, kind: input, shape index: {}]   ;;  %s3040_s10 = inlined_call_operand.vmem [shape: f32[1,32], index: 10, kind: input, shape index: {}]   ;;  %s3041_s11 = inlined_call_operand.hbm [shape: f32[6,8,96], index: 11, kind: output, shape index: {0}]   ;;  %s3042_s12 = inlined_call_operand.vmem [shape: f32[6,8,32], index: 12, kind: output, shape index: {1}]   ;;  %s3043_s13 = inlined_call_operand.hbm [shape: f32[6,8,32], index: 13, kind: output, shape index: {2}]  }
   0x1   :  { %20 = vsyncpa [#allocation6], 0 }
   0x2   :  { %21 = vsyncpa [#allocation9], 0 }
   0x3   :  { %22 = vsyncpa [#allocation12], 0 }
   0x4   :  { %23 = vsyncpa [#allocation15], 0 }
   0x5   :  { %24 = vsyncpa [#allocation4], 0 }
   0x6   :  { %25 = vsyncpa [#allocation18], 0  ;;  %s2566_s25 = smov [#allocation5]   ;;  %s2332_s29 = scalar_lea.hbm %s3031_s1, 128 }
   0x7   :  { %s44_s26 = sshll.u32 %s2566_s25, 4  ;;  %p2333_p0 = scmp.ne.s32.totalorder %s3031_s1, %s2332_s29  ;;  %s45_s26 = int_to_ptr.vmem [resolvable:$true] %s44_s26 }
   0x8   :  { %p2336_p1 = scmp.lt.u32.totalorder %s2332_s29, %s3031_s1 }
   0xa   :  { %p2338_p2 = pnand %p2336_p1, %p2333_p0 }
   0xc   :  { %2341 = shalt.err (!%p2338_p2)
}
   0xd   :  { %s2342_s17 = scalar_lea.vmem %s45_s26, 128  ;;  %p2347_p4 = scmp.lt.s32.totalorder %s45_s26, %s45_s26 }
   0xe   :  { %p2343_p3 = scmp.ne.s32.totalorder %s45_s26, %s2342_s17  ;;  %p2348_p5 = scmp.lt.s32.totalorder %s2342_s17, %s2342_s17 }
  0x10   :  { %p2349_p6 = por %p2348_p5, %p2347_p4 }
  0x12   :  { %p2350_p7 = pnand %p2349_p6, %p2343_p3 }
  0x14   :  { %2353 = shalt.err (!%p2350_p7)
}
  0x15   :  { %47 = dma.hbm_to_vmem [thread:$0]  %s3031_s1, 128, %s45_s26, [#allocation6]  }
  0x16   :  { %s2567_s20 = smov [#allocation8]   ;;  %s2568_s22 = smov [#allocation11]  }
  0x17   :  { %s65_s21 = sshll.u32 %s2567_s20, 4  ;;  %s89_s23 = sshll.u32 %s2568_s22, 4  ;;  %s66_s21 = int_to_ptr.vmem [resolvable:$true] %s65_s21  ;;  %s90_s23 = int_to_ptr.vmem [resolvable:$true] %s89_s23 }
  0x18   :  { %s2354_s27 = scalar_lea.hbm %s3034_s4, 512 }
  0x19   :  { %p2355_p8 = scmp.ne.s32.totalorder %s3034_s4, %s2354_s27  ;;  %p2358_p9 = scmp.lt.u32.totalorder %s2354_s27, %s3034_s4 }
  0x1b   :  { %p2360_p10 = pnand %p2358_p9, %p2355_p8 }
  0x1d   :  { %2363 = shalt.err (!%p2360_p10)
}
  0x1e   :  { %s2364_s1 = scalar_lea.vmem %s66_s21, 512  ;;  %p2369_p12 = scmp.lt.s32.totalorder %s66_s21, %s66_s21 }
  0x1f   :  { %p2365_p11 = scmp.ne.s32.totalorder %s66_s21, %s2364_s1  ;;  %p2370_p13 = scmp.lt.s32.totalorder %s2364_s1, %s2364_s1 }
  0x21   :  { %p2371_p0 = por %p2370_p13, %p2369_p12 }
  0x23   :  { %p2372_p1 = pnand %p2371_p0, %p2365_p11 }
  0x25   :  { %2375 = shalt.err (!%p2372_p1)
}
  0x26   :  { %s2569_s26 = smov 128   ;;  %s2570_s15 = smov 8  }
  0x27   :  { %71 = dma.hbm_to_vmem [thread:$0]  %s3034_s4, 512, %s66_s21, [#allocation9], %s2569_s26, %s2569_s26, %s2570_s15  }
  0x28   :  { %s2376_s20 = scalar_lea.hbm %s3036_s6, 512 }
  0x29   :  { %p2377_p2 = scmp.ne.s32.totalorder %s3036_s6, %s2376_s20  ;;  %p2380_p3 = scmp.lt.u32.totalorder %s2376_s20, %s3036_s6 }
  0x2b   :  { %p2382_p4 = pnand %p2380_p3, %p2377_p2 }
  0x2d   :  { %2385 = shalt.err (!%p2382_p4)
}
  0x2e   :  { %s2386_s28 = scalar_lea.vmem %s90_s23, 512  ;;  %p2391_p6 = scmp.lt.s32.totalorder %s90_s23, %s90_s23 }
  0x2f   :  { %p2387_p5 = scmp.ne.s32.totalorder %s90_s23, %s2386_s28  ;;  %p2392_p7 = scmp.lt.s32.totalorder %s2386_s28, %s2386_s28 }
  0x31   :  { %p2393_p8 = por %p2392_p7, %p2391_p6 }
  0x33   :  { %p2394_p9 = pnand %p2393_p8, %p2387_p5 }
  0x35   :  { %2397 = shalt.err (!%p2394_p9)
}
  0x36   :  { %95 = dma.hbm_to_vmem [thread:$0]  %s3036_s6, 512, %s90_s23, [#allocation12], %s2569_s26, %s2569_s26, %s2570_s15  }
  0x37   :  { %s2571_s29 = smov [#allocation2]   ;;  %s2572_s14 = smov [#allocation7]  }
  0x38   :  { %s31_s30 = sshll.u32 %s2571_s29, 4  ;;  %s54_s1 = sshll.u32 %s2572_s14, 4  ;;  %s32_s30 = int_to_ptr.vmem [resolvable:$true] %s31_s30  ;;  %s55_s1 = int_to_ptr.vmem [resolvable:$true] %s54_s1 }
  0x39   :  { %s2398_s18 = scalar_lea.hbm %s3030_s0, 768 }
  0x3a   :  { %p2399_p10 = scmp.ne.s32.totalorder %s3030_s0, %s2398_s18  ;;  %p2402_p11 = scmp.lt.u32.totalorder %s2398_s18, %s3030_s0 }
  0x3c   :  { %p2404_p12 = pnand %p2402_p11, %p2399_p10 }
  0x3e   :  { %2407 = shalt.err (!%p2404_p12)
}
  0x3f   :  { %s2408_s6 = scalar_lea.vmem %s32_s30, 768  ;;  %p2413_p0 = scmp.lt.s32.totalorder %s32_s30, %s32_s30 }
  0x40   :  { %p2409_p13 = scmp.ne.s32.totalorder %s32_s30, %s2408_s6  ;;  %p2414_p1 = scmp.lt.s32.totalorder %s2408_s6, %s2408_s6 }
  0x42   :  { %p2415_p2 = por %p2414_p1, %p2413_p0 }
  0x44   :  { %p2416_p3 = pnand %p2415_p2, %p2409_p13 }
  0x46   :  { %2419 = shalt.err (!%p2416_p3)
}
  0x47   :  { %37 = dma.hbm_to_vmem [thread:$0]  %s3030_s0, 768, %s32_s30, [#allocation3], %s2569_s26, %s2569_s26, %s2570_s15  }
  0x48   :  { %s2420_s4 = scalar_lea.hbm %s3032_s2, 128 }
  0x49   :  { %p2421_p4 = scmp.ne.s32.totalorder %s3032_s2, %s2420_s4  ;;  %p2424_p5 = scmp.lt.u32.totalorder %s2420_s4, %s3032_s2 }
  0x4b   :  { %p2426_p6 = pnand %p2424_p5, %p2421_p4 }
  0x4d   :  { %2429 = shalt.err (!%p2426_p6)
}
  0x4e   :  { %s2430_s17 = scalar_lea.vmem %s55_s1, 128  ;;  %p2435_p8 = scmp.lt.s32.totalorder %s55_s1, %s55_s1 }
  0x4f   :  { %p2431_p7 = scmp.ne.s32.totalorder %s55_s1, %s2430_s17  ;;  %p2436_p9 = scmp.lt.s32.totalorder %s2430_s17, %s2430_s17 }
  0x51   :  { %p2437_p10 = por %p2436_p9, %p2435_p8 }
  0x53   :  { %p2438_p11 = pnand %p2437_p10, %p2431_p7 }
  0x55   :  { %2441 = shalt.err (!%p2438_p11)
}
  0x56   :  { %57 = dma.hbm_to_vmem [thread:$0]  %s3032_s2, 128, %s55_s1, [#allocation6]  }
  0x57   :  { %s2573_s18 = smov [#allocation10]   ;;  %s2574_s20 = smov [#allocation13]  }
  0x58   :  { %s77_s19 = sshll.u32 %s2573_s18, 4  ;;  %s101_s22 = sshll.u32 %s2574_s20, 4  ;;  %s78_s19 = int_to_ptr.vmem [resolvable:$true] %s77_s19  ;;  %s102_s22 = int_to_ptr.vmem [resolvable:$true] %s101_s22 }
  0x59   :  { %s2442_s23 = scalar_lea.hbm %s3035_s5, 512 }
  0x5a   :  { %p2443_p12 = scmp.ne.s32.totalorder %s3035_s5, %s2442_s23  ;;  %p2446_p13 = scmp.lt.u32.totalorder %s2442_s23, %s3035_s5 }
  0x5c   :  { %p2448_p0 = pnand %p2446_p13, %p2443_p12 }
  0x5e   :  { %2451 = shalt.err (!%p2448_p0)
}
  0x5f   :  { %s2452_s2 = scalar_lea.vmem %s78_s19, 512  ;;  %p2457_p2 = scmp.lt.s32.totalorder %s78_s19, %s78_s19 }
  0x60   :  { %p2453_p1 = scmp.ne.s32.totalorder %s78_s19, %s2452_s2  ;;  %p2458_p3 = scmp.lt.s32.totalorder %s2452_s2, %s2452_s2 }
  0x62   :  { %p2459_p4 = por %p2458_p3, %p2457_p2 }
  0x64   :  { %p2460_p5 = pnand %p2459_p4, %p2453_p1 }
  0x66   :  { %2463 = shalt.err (!%p2460_p5)
}
  0x67   :  { %83 = dma.hbm_to_vmem [thread:$0]  %s3035_s5, 512, %s78_s19, [#allocation9], %s2569_s26, %s2569_s26, %s2570_s15  }
  0x68   :  { %s2464_s16 = scalar_lea.hbm %s3037_s7, 512 }
  0x69   :  { %p2465_p6 = scmp.ne.s32.totalorder %s3037_s7, %s2464_s16  ;;  %p2468_p7 = scmp.lt.u32.totalorder %s2464_s16, %s3037_s7 }
  0x6b   :  { %p2470_p8 = pnand %p2468_p7, %p2465_p6 }
  0x6d   :  { %2473 = shalt.err (!%p2470_p8)
}
  0x6e   :  { %s2474_s20 = scalar_lea.vmem %s102_s22, 512  ;;  %p2479_p10 = scmp.lt.s32.totalorder %s102_s22, %s102_s22 }
  0x6f   :  { %p2475_p9 = scmp.ne.s32.totalorder %s102_s22, %s2474_s20  ;;  %p2480_p11 = scmp.lt.s32.totalorder %s2474_s20, %s2474_s20 }
  0x71   :  { %p2481_p12 = por %p2480_p11, %p2479_p10 }
  0x73   :  { %p2482_p13 = pnand %p2481_p12, %p2475_p9 }
  0x75   :  { %2485 = shalt.err (!%p2482_p13)
}
  0x76   :  { %107 = dma.hbm_to_vmem [thread:$0]  %s3037_s7, 512, %s102_s22, [#allocation12], %s2569_s26, %s2569_s26, %s2570_s15  }
  0x77   :  { %s2575_s24 = smov [#allocation14]   ;;  %s2486_s27 = scalar_lea.hbm %s3038_s8, 512 }
  0x78   :  { %s113_s6 = sshll.u32 %s2575_s24, 4  ;;  %p2487_p0 = scmp.ne.s32.totalorder %s3038_s8, %s2486_s27  ;;  %s114_s6 = int_to_ptr.vmem [resolvable:$true] %s113_s6 }
  0x79   :  { %p2490_p1 = scmp.lt.u32.totalorder %s2486_s27, %s3038_s8 }
  0x7b   :  { %p2492_p2 = pnand %p2490_p1, %p2487_p0 }
  0x7d   :  { %2495 = shalt.err (!%p2492_p2)
}
  0x7e   :  { %s2496_s21 = scalar_lea.vmem %s114_s6, 512  ;;  %p2501_p4 = scmp.lt.s32.totalorder %s114_s6, %s114_s6 }
  0x7f   :  { %p2497_p3 = scmp.ne.s32.totalorder %s114_s6, %s2496_s21  ;;  %p2502_p5 = scmp.lt.s32.totalorder %s2496_s21, %s2496_s21 }
  0x81   :  { %p2503_p6 = por %p2502_p5, %p2501_p4 }
  0x83   :  { %p2504_p7 = pnand %p2503_p6, %p2497_p3 }
  0x85   :  { %2507 = shalt.err (!%p2504_p7)
}
  0x86   :  { %119 = dma.hbm_to_vmem [thread:$0]  %s3038_s8, 512, %s114_s6, [#allocation15], %s2569_s26, %s2569_s26, %s2570_s15  }
  0x87   :  { %2552 = dma.done.wait [#allocation3], 768  }
  0x88   :  { %2553 = vsyncadd [#allocation3], 4294966528 }
  0x89   :  { %2554 = dma.done.wait [#allocation6], 256  }
  0x8a   :  { %2555 = vsyncadd [#allocation6], 4294967040 }
  0x8b   :  { %2556 = dma.done.wait [#allocation9], 1024  }
  0x8c   :  { %2557 = vsyncadd [#allocation9], 4294966272 }
  0x8d   :  { %2558 = dma.done.wait [#allocation12], 1024  }
  0x8e   :  { %2559 = vsyncadd [#allocation12], 4294966272 }
  0x8f   :  { %2560 = dma.done.wait [#allocation15], 512  }
  0x90   :  { %2561 = vsyncadd [#allocation15], 4294966784  ;;  %v2576_v0 = vmov 0.0|0.0   ;;  %vm2577_vm0 = vmmov 0   ;;  %v2578_v1 = vmov 0.0   ;;  %v148_v2 = vld [vmem:[#allocation8] sm:$0xff] }
  0x91   :  { %2153 = vmatprep.subr.bf16.mxu0 %v2576_v0  ;;  %2159 = vmatprep.subr.bf16.mxu1 %v2576_v0  ;;  %v149_v3 = vld [vmem:[#allocation8 + $0x8] sm:$0xff]  ;;  %v250_v4 = vld [vmem:[#allocation11] sm:$0xff]  ;;  %v150_v7 = vld [vmem:[#allocation8 + $0x10] sm:$0xff]  ;;  %vm175_vm1 = vcmask 261120   ;;  %vm503_vm2 = vcmask 785408   ;;  %s2579_s16 = smov 64  }
  0x92   :  { %1952 = vmatprep.mubr.msk.f32.mxu0 %vm2577_vm0, %v2578_v1  ;;  %1963 = vmatprep.mubr.msk.f32.mxu1 %vm2577_vm0, %v2578_v1  ;;  %v2773_v5 = vpack.c.bf16 %v149_v3, %v148_v2  ;;  %v251_v6 = vld [vmem:[#allocation11 + $0x8] sm:$0xff]  ;;  %v151_v8 = vld [vmem:[#allocation8 + $0x18] sm:$0xff]  ;;  %v252_v10 = vld [vmem:[#allocation11 + $0x10] sm:$0xff]  ;;  %s2580_s17 = smov 96   ;;  %s2581_s27 = smov [#allocation16]  }
  0x93   :  { %v2160_v9 = vpack.c.bf16 %v251_v6, %v250_v4  ;;  %v253_v11 = vld [vmem:[#allocation11 + $0x18] sm:$0xff]  ;;  %v2776_v12 = vpack.c.bf16 %v151_v8, %v150_v7  ;;  %v152_v14 = vld [vmem:[#allocation10] sm:$0xff]  ;;  %v153_v15 = vld [vmem:[#allocation10 + $0x8] sm:$0xff]  ;;  %s1781_s28 = sshll.u32 %s2581_s27, 4  ;;  %s2582_s4 = smov [#allocation17]   ;;  %s1782_s28 = int_to_ptr.vmem [resolvable:$true] %s1781_s28 }
  0x94   :  { %2155 = vmatpush3.bf16.msra.mxu0 %v2773_v5  ;;  %v2163_v13 = vpack.c.bf16 %v253_v11, %v252_v10  ;;  %v398_v16 = vld [vmem:[#allocation13] sm:$0xff]  ;;  %v399_v17 = vld [vmem:[#allocation13 + $0x8] sm:$0xff]  ;;  %v2781_v19 = vpack.c.bf16 %v153_v15, %v152_v14  ;;  %v249_v20 = vld [vmem:[#allocation5] sm:$0xff]  ;;  %s1795_s2 = sshll.u32 %s2582_s4, 4  ;;  %s2508_s1 = scalar_lea.vmem %s1782_s28, 768  ;;  %s2988_s2 = int_to_ptr.vmem [resolvable:$true] %s1795_s2 }
  0x95   :  { %2161 = vmatpush3.bf16.msra.mxu1 %v2160_v9  ;;  %2156 = vmatprep.subr.bf16.mxu0 %v2576_v0  ;;  %v174_v18 = vld [vmem:[#allocation2] sm:$0xff]  ;;  %v2172_v21 = vpack.c.bf16 %v399_v17, %v398_v16  ;;  %v154_v22 = vld [vmem:[#allocation10 + $0x10] sm:$0xff]  ;;  %v155_v23 = vld [vmem:[#allocation10 + $0x18] sm:$0xff]  ;;  %p2509_p8 = scmp.ne.s32.totalorder %s1782_s28, %s2508_s1  ;;  %p2513_p9 = scmp.lt.s32.totalorder %s1782_s28, %s1782_s28 }
  0x96   :  { %2162 = vmatprep.subr.bf16.mxu1 %v2576_v0  ;;  %v400_v24 = vld [vmem:[#allocation13 + $0x10] sm:$0xff]  ;;  %v401_v25 = vld [vmem:[#allocation13 + $0x18] sm:$0xff]  ;;  %v2788_v26 = vpack.c.bf16 %v155_v23, %v154_v22  ;;  %v512_v54 = vld [vmem:[#allocation2 + $0x8] sm:$0xff]  ;;  %p2514_p10 = scmp.lt.s32.totalorder %s2508_s1, %s2508_s1 }
  0x97   :  { %v2175_v27 = vpack.c.bf16 %v401_v25, %v400_v24  ;;  %v397_v28 = vld [vmem:[%s3033_s3] sm:$0xff]  ;;  %v484_v49 = vld [vmem:[#allocation7] sm:$0xff]  ;;  %v156_v55 = vld [vmem:[#allocation14] sm:$0xff] }
  0x98   :  { %2158 = vmatpush3.bf16.msra.mxu0 %v2776_v12  ;;  %v2816_v37 = vld [vmem:[%s3039_s9] ss:$0 sm:$0xff]  ;;  %v157_v56 = vld [vmem:[#allocation14 + $0x8] sm:$0xff]  ;;  %v159_v59 = vld [vmem:[#allocation14 + $0x18] sm:$0xff]  ;;  %p2515_p11 = por %p2514_p10, %p2513_p9 }
  0x99   :  { %2164 = vmatpush3.bf16.msra.mxu1 %v2163_v13  ;;  %2165 = vmatprep.subr.bf16.mxu0 %v2576_v0  ;;  %v2824_v48 = vld [vmem:[%s3040_s10] ss:$0 sm:$0xff]  ;;  %v2829_v57 = vpack.c.bf16 %v157_v56, %v156_v55 }
  0x9a   :  { %2171 = vmatprep.subr.bf16.mxu1 %v2576_v0  ;;  %v485_v50 = vmul.f32 %v2824_v48, %v484_v49  ;;  %v158_v58 = vld [vmem:[#allocation14 + $0x10] sm:$0xff]  ;;  %p2516_p12 = pnand %p2515_p11, %p2509_p8 }
  0x9b   :  { %1953 = vmatmul.mubr.msk.f32.vlgmr.msra.gmra.mrb[0].mxu0 %vm175_vm1, %v174_v18  ;;  %v2836_v60 = vpack.c.bf16 %v159_v59, %v158_v58  ;;  %v765_v25 = vld [vmem:[#allocation2 + $0x10] sm:$0xff] }
  0x9c   :  { %2167 = vmatpush3.bf16.msra.mxu0 %v2781_v19  ;;  %1964 = vmatmul.mubr.msk.f32.vlgmr.msra.gmra.mrb[0].mxu1 %vm175_vm1, %v249_v20 }
  0x9d   :  { %2173 = vmatpush3.bf16.msra.mxu1 %v2172_v21  ;;  %2168 = vmatprep.subr.bf16.mxu0 %v2576_v0 }
  0x9e   :  { %2174 = vmatprep.subr.bf16.mxu1 %v2576_v0  ;;  %1974 = vmatprep.mubr.msk.f32.mxu0 %vm2577_vm0, %v2578_v1 }
  0x9f   :  { %1985 = vmatprep.mubr.msk.f32.mxu1 %vm2577_vm0, %v2578_v1 }
  0xa0   :  { %2170 = vmatpush3.bf16.msra.mxu0 %v2788_v26 }
  0xa1   :  { %2176 = vmatpush3.bf16.msra.mxu1 %v2175_v27  ;;  %2177 = vmatprep.subr.bf16.mxu0 %v2576_v0 }
  0xa2   :  { %2183 = vmatprep.subr.bf16.mxu1 %v2576_v0 }
  0xa3   :  { %1975 = vmatmul.mubr.msk.f32.vlgmr.msra.gmra.mrb[2].mxu0 %vm175_vm1, %v174_v18 }
  0xa4   :  { %1986 = vmatmul.mubr.msk.f32.vlgmr.msra.gmra.mrb[2].mxu1 %vm175_vm1, %v397_v28  ;;  %2179 = vmatpush3.bf16.msra.mxu0 %v2773_v5 }
  0xa5   :  { %2180 = vmatprep.subr.bf16.mxu0 %v2576_v0  ;;  %1996 = vmatprep.mubr.msk.f32.mxu0 %vm2577_vm0, %v2578_v1 }
  0xa6   :  { %2007 = vmatprep.mubr.msk.f32.mxu1 %vm2577_vm0, %v2578_v1  ;;  %2185 = vmatpush3.bf16.msra.mxu1 %v2829_v57 }
  0xa7   :  { %2186 = vmatprep.subr.bf16.mxu1 %v2576_v0 }
  0xa8   :  { %2182 = vmatpush3.bf16.msra.mxu0 %v2776_v12 }
  0xa9   :  { %2189 = vmatprep.subr.bf16.mxu0 %v2576_v0 }
  0xaa   :  { %2188 = vmatpush3.bf16.msra.mxu1 %v2836_v60 }
  0xab   :  { %1997 = vmatmul.mubr.msk.f32.vlgmr.msra.gmra.mrb[4].mxu0 %vm175_vm1, %v512_v54  ;;  %2195 = vmatprep.subr.bf16.mxu1 %v2576_v0 }
  0xac   :  { %2191 = vmatpush3.bf16.msra.mxu0 %v2781_v19  ;;  %2018 = vmatprep.mubr.msk.f32.mxu0 %vm2577_vm0, %v2578_v1 }
  0xad   :  { %2192 = vmatprep.subr.bf16.mxu0 %v2576_v0 }
  0xb0   :  { %2194 = vmatpush3.bf16.msra.mxu0 %v2788_v26 }
  0xb1   :  { %2201 = vmatprep.subr.bf16.mxu0 %v2576_v0 }
  0xb3   :  { %2019 = vmatmul.mubr.msk.f32.vlgmr.msra.gmra.mrb[6].mxu0 %vm175_vm1, %v512_v54 }
  0xb4   :  { %2203 = vmatpush3.bf16.msra.mxu0 %v2829_v57  ;;  %2040 = vmatprep.mubr.msk.f32.mxu0 %vm2577_vm0, %v2578_v1 }
  0xb5   :  { %2204 = vmatprep.subr.bf16.mxu0 %v2576_v0 }
  0xb8   :  { %2206 = vmatpush3.bf16.msra.mxu0 %v2836_v60 }
  0xb9   :  { %2213 = vmatprep.subr.bf16.mxu0 %v2576_v0 }
 0x16e   :  { %v245_v29 = vpop.f32.mrb[0].mxu0 }
 0x16f   :  { %504 = vst.msk [vmem:[#allocation16] sm:$0xff] %vm503_vm2, %v245_v29  ;;  %v1954_v30 = vpop.f32.mrb[1].mxu0  ;;  %v323_v31 = vpop.f32.mrb[0].mxu1 }
 0x170   :  { %v1965_v32 = vpop.f32.mrb[1].mxu1 }
 0x176   :  { %v393_v33 = vpop.f32.mrb[2].mxu0 }
 0x177   :  { %v394_v34 = vadd.f32 %v393_v33, %v323_v31  ;;  %v1976_v35 = vpop.f32.mrb[3].mxu0  ;;  %v471_v36 = vpop.f32.mrb[2].mxu1 }
 0x178   :  { %v1987_v38 = vpop.f32.mrb[3].mxu1 }
 0x179   :  { %v475_v39 = vadd.f32 %v471_v36, %v394_v34 }
 0x17b   :  { %v476_v40 = vadd.f32 %v2816_v37, %v475_v39 }
 0x17d   :  { %2284 = vtanh.f32 %v476_v40  ;;  %v1823_v42 = vmul.f32 -1.442695, %v476_v40 }
 0x17e   :  { %v582_v2 = vpop.f32.mrb[4].mxu0 }
 0x17f   :  { %2286 = vpow2.f32 %v1823_v42  ;;  %755 = vst.msk [vmem:[#allocation16 + $0x8] sm:$0xff] %vm503_vm2, %v582_v2  ;;  %v1998_v3 = vpop.f32.mrb[5].mxu0 }
 0x186   :  { %v724_v4 = vpop.f32.mrb[6].mxu0 }
 0x187   :  { %v2285_v41 = vpop.eup %2284  ;;  %v2020_v6 = vpop.f32.mrb[7].mxu0 }
 0x188   :  { %488 = vrot.lane.b32.xlu0 %v2285_v41, %s2579_s16 }
 0x189   :  { %v2287_v43 = vpop.eup %2286 }
 0x18a   :  { %v480_v44 = vadd.f32 1.0, %v2287_v43 }
 0x18c   :  { %2288 = vrcp.f32 %v480_v44 }
 0x196   :  { %v2289_v45 = vpop.eup %2288 }
 0x197   :  { %v486_v51 = vmul.f32 %v2289_v45, %v485_v50 }
 0x1fa   :  { %v489_v46 = vpop.permute.xlu0 %488 }
 0x1fb   :  { %v491_v47 = vmul.f32 %v2289_v45, %v489_v46 }
 0x1fd   :  { %493 = vrot.lane.b32.xlu0 %v491_v47, %s2580_s17 }
 0x26f   :  { %v494_v52 = vpop.permute.xlu0 %493 }
 0x270   :  { %v496_v53 = vadd.f32 %v494_v52, %v486_v51  ;;  %v1018_v52 = vld [vmem:[#allocation2 + $0x18] sm:$0xff] }
 0x272   :  { %2290 = vtanh.f32 %v496_v53  ;;  %510 = vst.msk [vmem:[#allocation17] sm:$0xff] %vm175_vm1, %v496_v53  ;;  %v736_v21 = vmul.f32 %v2824_v48, %v496_v53 }
 0x27c   :  { %v2291_v61 = vpop.eup %2290 }
 0x27d   :  { %499 = vrot.lane.b32.xlu1 %v2291_v61, %s2579_s16 }
 0x2ef   :  { %v500_v62 = vpop.permute.xlu1 %499 }
 0x2f0   :  { %v502_v63 = vmul.f32 %v2289_v45, %v500_v62 }
 0x2f2   :  { %506 = vrot.lane.b32.xlu1 %v502_v63, %s2579_s16 }
 0x364   :  { %v507_v7 = vpop.permute.xlu1 %506 }
 0x365   :  { %509 = vst.msk [vmem:[%s3042_s12] sm:$0xff] %vm175_vm1, %v507_v7  ;;  %2008 = vmatmul.mubr.msk.f32.vlgmr.msra.gmra.mrb[4].mxu1 %vm175_vm1, %v507_v7 }
 0x366   :  { %2197 = vmatpush3.bf16.msra.mxu1 %v2773_v5  ;;  %2029 = vmatprep.mubr.msk.f32.mxu1 %vm2577_vm0, %v2578_v1 }
 0x367   :  { %2198 = vmatprep.subr.bf16.mxu1 %v2576_v0 }
 0x36a   :  { %2200 = vmatpush3.bf16.msra.mxu1 %v2776_v12 }
 0x36b   :  { %2207 = vmatprep.subr.bf16.mxu1 %v2576_v0 }
 0x36d   :  { %2030 = vmatmul.mubr.msk.f32.vlgmr.msra.gmra.mrb[6].mxu1 %vm175_vm1, %v765_v25 }
 0x36e   :  { %2209 = vmatpush3.bf16.msra.mxu1 %v2781_v19  ;;  %2051 = vmatprep.mubr.msk.f32.mxu1 %vm2577_vm0, %v2578_v1 }
 0x36f   :  { %2210 = vmatprep.subr.bf16.mxu1 %v2576_v0 }
 0x372   :  { %2212 = vmatpush3.bf16.msra.mxu1 %v2788_v26 }
 0x373   :  { %2219 = vmatprep.subr.bf16.mxu1 %v2576_v0 }
 0x375   :  { %2052 = vmatmul.mubr.msk.f32.vlgmr.msra.gmra.mrb[8].mxu1 %vm175_vm1, %v765_v25 }
 0x376   :  { %2221 = vmatpush3.bf16.msra.mxu1 %v2829_v57  ;;  %2073 = vmatprep.mubr.msk.f32.mxu1 %vm2577_vm0, %v2578_v1 }
 0x377   :  { %2222 = vmatprep.subr.bf16.mxu1 %v2576_v0 }
 0x37a   :  { %2224 = vmatpush3.bf16.msra.mxu1 %v2836_v60 }
 0x37b   :  { %2231 = vmatprep.subr.bf16.mxu1 %v2576_v0 }
 0x438   :  { %v654_v8 = vpop.f32.mrb[4].mxu1 }
 0x439   :  { %v725_v9 = vadd.f32 %v724_v4, %v654_v8  ;;  %v2009_v10 = vpop.f32.mrb[5].mxu1 }
 0x43b   :  { %v728_v11 = vadd.f32 %v2816_v37, %v725_v9 }
 0x43d   :  { %2292 = vtanh.f32 %v728_v11  ;;  %v1827_v14 = vmul.f32 -1.442695, %v728_v11 }
 0x43f   :  { %2294 = vpow2.f32 %v1827_v14 }
 0x440   :  { %v835_v30 = vpop.f32.mrb[6].mxu1 }
 0x441   :  { %1008 = vst.msk [vmem:[#allocation16 + $0x10] sm:$0xff] %vm503_vm2, %v835_v30  ;;  %v2031_v31 = vpop.f32.mrb[7].mxu1 }
 0x447   :  { %v2293_v13 = vpop.eup %2292 }
 0x448   :  { %739 = vrot.lane.b32.xlu0 %v2293_v13, %s2579_s16  ;;  %v977_v32 = vpop.f32.mrb[8].mxu1 }
 0x449   :  { %v2295_v15 = vpop.eup %2294  ;;  %v2053_v33 = vpop.f32.mrb[9].mxu1 }
 0x44a   :  { %v732_v16 = vadd.f32 1.0, %v2295_v15 }
 0x44c   :  { %2296 = vrcp.f32 %v732_v16 }
 0x456   :  { %v2297_v17 = vpop.eup %2296 }
 0x457   :  { %v737_v22 = vmul.f32 %v2297_v17, %v736_v21 }
 0x4ba   :  { %v740_v18 = vpop.permute.xlu0 %739 }
 0x4bb   :  { %v742_v20 = vmul.f32 %v2297_v17, %v740_v18  ;;  %v1271_v18 = vld [vmem:[#allocation2 + $0x20] sm:$0xff] }
 0x4bd   :  { %744 = vrot.lane.b32.xlu1 %v742_v20, %s2580_s17 }
 0x52f   :  { %v745_v23 = vpop.permute.xlu1 %744 }
 0x530   :  { %v747_v24 = vadd.f32 %v745_v23, %v737_v22 }
 0x532   :  { %2298 = vtanh.f32 %v747_v24  ;;  %763 = vst.msk [vmem:[#allocation17 + $0x8] sm:$0xff] %vm175_vm1, %v747_v24  ;;  %v989_v47 = vmul.f32 %v2824_v48, %v747_v24 }
 0x53c   :  { %v2299_v27 = vpop.eup %2298 }
 0x53d   :  { %750 = vrot.lane.b32.xlu0 %v2299_v27, %s2579_s16 }
 0x5af   :  { %v751_v28 = vpop.permute.xlu0 %750 }
 0x5b0   :  { %v753_v29 = vmul.f32 %v2297_v17, %v751_v28 }
 0x5b2   :  { %757 = vrot.lane.b32.xlu1 %v753_v29, %s2579_s16 }
 0x624   :  { %v758_v34 = vpop.permute.xlu1 %757 }
 0x625   :  { %1828 = vst.msk [vmem:[%s3042_s12 + $0x8] sm:$0xff] %vm175_vm1, %v758_v34  ;;  %2041 = vmatmul.mubr.msk.f32.vlgmr.msra.gmra.mrb[8].mxu0 %vm175_vm1, %v758_v34 }
 0x626   :  { %2215 = vmatpush3.bf16.msra.mxu0 %v2773_v5  ;;  %2062 = vmatprep.mubr.msk.f32.mxu0 %vm2577_vm0, %v2578_v1 }
 0x627   :  { %2216 = vmatprep.subr.bf16.mxu0 %v2576_v0 }
 0x62a   :  { %2218 = vmatpush3.bf16.msra.mxu0 %v2776_v12 }
 0x62b   :  { %2225 = vmatprep.subr.bf16.mxu0 %v2576_v0 }
 0x62d   :  { %2063 = vmatmul.mubr.msk.f32.vlgmr.msra.gmra.mrb[10].mxu0 %vm175_vm1, %v1018_v52 }
 0x62e   :  { %2227 = vmatpush3.bf16.msra.mxu0 %v2781_v19  ;;  %2084 = vmatprep.mubr.msk.f32.mxu0 %vm2577_vm0, %v2578_v1 }
 0x62f   :  { %2228 = vmatprep.subr.bf16.mxu0 %v2576_v0 }
 0x632   :  { %2230 = vmatpush3.bf16.msra.mxu0 %v2788_v26 }
 0x633   :  { %2237 = vmatprep.subr.bf16.mxu0 %v2576_v0 }
 0x635   :  { %2085 = vmatmul.mubr.msk.f32.vlgmr.msra.gmra.mrb[12].mxu0 %vm175_vm1, %v1018_v52 }
 0x636   :  { %2239 = vmatpush3.bf16.msra.mxu0 %v2829_v57  ;;  %2106 = vmatprep.mubr.msk.f32.mxu0 %vm2577_vm0, %v2578_v1 }
 0x637   :  { %2240 = vmatprep.subr.bf16.mxu0 %v2576_v0 }
 0x63a   :  { %2242 = vmatpush3.bf16.msra.mxu0 %v2836_v60 }
 0x63b   :  { %2249 = vmatprep.subr.bf16.mxu0 %v2576_v0 }
 0x6f8   :  { %v907_v35 = vpop.f32.mrb[8].mxu0 }
 0x6f9   :  { %v978_v36 = vadd.f32 %v977_v32, %v907_v35  ;;  %v2042_v38 = vpop.f32.mrb[9].mxu0 }
 0x6fb   :  { %v981_v39 = vadd.f32 %v2816_v37, %v978_v36 }
 0x6fd   :  { %2300 = vtanh.f32 %v981_v39  ;;  %v1832_v41 = vmul.f32 -1.442695, %v981_v39 }
 0x6ff   :  { %2302 = vpow2.f32 %v1832_v41  ;;  %v1524_v41 = vld [vmem:[#allocation2 + $0x28] sm:$0xff] }
 0x700   :  { %v1088_v56 = vpop.f32.mrb[10].mxu0 }
 0x701   :  { %1261 = vst.msk [vmem:[#allocation16 + $0x18] sm:$0xff] %vm503_vm2, %v1088_v56  ;;  %v2064_v58 = vpop.f32.mrb[11].mxu0 }
 0x707   :  { %v2301_v40 = vpop.eup %2300 }
 0x708   :  { %992 = vrot.lane.b32.xlu0 %v2301_v40, %s2579_s16  ;;  %v1230_v59 = vpop.f32.mrb[12].mxu0 }
 0x709   :  { %v2303_v42 = vpop.eup %2302  ;;  %v2086_v61 = vpop.f32.mrb[13].mxu0 }
 0x70a   :  { %v985_v43 = vadd.f32 1.0, %v2303_v42 }
 0x70c   :  { %2304 = vrcp.f32 %v985_v43 }
 0x716   :  { %v2305_v44 = vpop.eup %2304 }
 0x717   :  { %v990_v49 = vmul.f32 %v2305_v44, %v989_v47 }
 0x77a   :  { %v993_v45 = vpop.permute.xlu0 %992 }
 0x77b   :  { %v995_v46 = vmul.f32 %v2305_v44, %v993_v45 }
 0x77d   :  { %997 = vrot.lane.b32.xlu1 %v995_v46, %s2580_s17 }
 0x7ef   :  { %v998_v50 = vpop.permute.xlu1 %997 }
 0x7f0   :  { %v1000_v51 = vadd.f32 %v998_v50, %v990_v49 }
 0x7f2   :  { %2306 = vtanh.f32 %v1000_v51  ;;  %1016 = vst.msk [vmem:[#allocation17 + $0x10] sm:$0xff] %vm175_vm1, %v1000_v51  ;;  %v1242_v14 = vmul.f32 %v2824_v48, %v1000_v51 }
 0x7fc   :  { %v2307_v53 = vpop.eup %2306 }
 0x7fd   :  { %1003 = vrot.lane.b32.xlu0 %v2307_v53, %s2579_s16 }
 0x86f   :  { %v1004_v54 = vpop.permute.xlu0 %1003 }
 0x870   :  { %v1006_v55 = vmul.f32 %v2305_v44, %v1004_v54 }
 0x872   :  { %1010 = vrot.lane.b32.xlu1 %v1006_v55, %s2579_s16 }
 0x8e4   :  { %v1011_v62 = vpop.permute.xlu1 %1010 }
 0x8e5   :  { %1833 = vst.msk [vmem:[%s3042_s12 + $0x10] sm:$0xff] %vm175_vm1, %v1011_v62  ;;  %2074 = vmatmul.mubr.msk.f32.vlgmr.msra.gmra.mrb[10].mxu1 %vm175_vm1, %v1011_v62 }
 0x8e6   :  { %2233 = vmatpush3.bf16.msra.mxu1 %v2773_v5  ;;  %2095 = vmatprep.mubr.msk.f32.mxu1 %vm2577_vm0, %v2578_v1 }
 0x8e7   :  { %2234 = vmatprep.subr.bf16.mxu1 %v2576_v0 }
 0x8ea   :  { %2236 = vmatpush3.bf16.msra.mxu1 %v2776_v12 }
 0x8eb   :  { %2243 = vmatprep.subr.bf16.mxu1 %v2576_v0 }
 0x8ed   :  { %2096 = vmatmul.mubr.msk.f32.vlgmr.msra.gmra.mrb[12].mxu1 %vm175_vm1, %v1271_v18 }
 0x8ee   :  { %2245 = vmatpush3.bf16.msra.mxu1 %v2781_v19  ;;  %2117 = vmatprep.mubr.msk.f32.mxu1 %vm2577_vm0, %v2578_v1 }
 0x8ef   :  { %2246 = vmatprep.subr.bf16.mxu1 %v2576_v0 }
 0x8f2   :  { %2248 = vmatpush3.bf16.msra.mxu1 %v2788_v26 }
 0x8f3   :  { %2255 = vmatprep.subr.bf16.mxu1 %v2576_v0 }
 0x8f5   :  { %2118 = vmatmul.mubr.msk.f32.vlgmr.msra.gmra.mrb[14].mxu1 %vm175_vm1, %v1271_v18 }
 0x8f6   :  { %2257 = vmatpush3.bf16.msra.mxu1 %v2829_v57  ;;  %2139 = vmatprep.mubr.msk.f32.mxu1 %vm2577_vm0, %v2578_v1 }
 0x8f7   :  { %2258 = vmatprep.subr.bf16.mxu1 %v2576_v0 }
 0x8fa   :  { %2260 = vmatpush3.bf16.msra.mxu1 %v2836_v60 }
 0x9b8   :  { %v1160_v63 = vpop.f32.mrb[10].mxu1 }
 0x9b9   :  { %v1231_v2 = vadd.f32 %v1230_v59, %v1160_v63  ;;  %v2075_v3 = vpop.f32.mrb[11].mxu1 }
 0x9bb   :  { %v1234_v4 = vadd.f32 %v2816_v37, %v1231_v2 }
 0x9bd   :  { %2308 = vtanh.f32 %v1234_v4  ;;  %v1837_v7 = vmul.f32 -1.442695, %v1234_v4 }
 0x9bf   :  { %2310 = vpow2.f32 %v1837_v7 }
 0x9c0   :  { %v1341_v23 = vpop.f32.mrb[12].mxu1 }
 0x9c1   :  { %1514 = vst.msk [vmem:[#allocation16 + $0x20] sm:$0xff] %vm503_vm2, %v1341_v23  ;;  %v2097_v24 = vpop.f32.mrb[13].mxu1 }
 0x9c7   :  { %v2309_v6 = vpop.eup %2308 }
 0x9c8   :  { %1245 = vrot.lane.b32.xlu0 %v2309_v6, %s2579_s16  ;;  %v1483_v25 = vpop.f32.mrb[14].mxu1 }
 0x9c9   :  { %v2311_v8 = vpop.eup %2310  ;;  %v2119_v27 = vpop.f32.mrb[15].mxu1 }
 0x9ca   :  { %v1238_v9 = vadd.f32 1.0, %v2311_v8 }
 0x9cc   :  { %2312 = vrcp.f32 %v1238_v9 }
 0x9d6   :  { %v2313_v10 = vpop.eup %2312 }
 0x9d7   :  { %v1243_v15 = vmul.f32 %v2313_v10, %v1242_v14 }
 0xa3a   :  { %v1246_v11 = vpop.permute.xlu0 %1245 }
 0xa3b   :  { %v1248_v13 = vmul.f32 %v2313_v10, %v1246_v11 }
 0xa3d   :  { %1250 = vrot.lane.b32.xlu1 %v1248_v13, %s2580_s17 }
 0xaaf   :  { %v1251_v16 = vpop.permute.xlu1 %1250 }
 0xab0   :  { %v1253_v17 = vadd.f32 %v1251_v16, %v1243_v15 }
 0xab2   :  { %2314 = vtanh.f32 %v1253_v17  ;;  %1269 = vst.msk [vmem:[#allocation17 + $0x18] sm:$0xff] %vm175_vm1, %v1253_v17 }
 0xabc   :  { %v2315_v20 = vpop.eup %2314 }
 0xabd   :  { %1256 = vrot.lane.b32.xlu0 %v2315_v20, %s2579_s16 }
 0xb2f   :  { %v1257_v21 = vpop.permute.xlu0 %1256 }
 0xb30   :  { %v1259_v22 = vmul.f32 %v2313_v10, %v1257_v21 }
 0xb32   :  { %1263 = vrot.lane.b32.xlu1 %v1259_v22, %s2579_s16 }
 0xba4   :  { %v1264_v57 = vpop.permute.xlu1 %1263 }
 0xba5   :  { %1838 = vst.msk [vmem:[%s3042_s12 + $0x18] sm:$0xff] %vm175_vm1, %v1264_v57  ;;  %2107 = vmatmul.mubr.msk.f32.vlgmr.msra.gmra.mrb[14].mxu0 %vm175_vm1, %v1264_v57 }
 0xba6   :  { %2251 = vmatpush3.bf16.msra.mxu0 %v2773_v5  ;;  %2128 = vmatprep.mubr.msk.f32.mxu0 %vm2577_vm0, %v2578_v1 }
 0xba7   :  { %2252 = vmatprep.subr.bf16.mxu0 %v2576_v0 }
 0xbaa   :  { %2254 = vmatpush3.bf16.msra.mxu0 %v2776_v12  ;;  %v1495_v12 = vmul.f32 %v2824_v48, %v1253_v17 }
 0xbab   :  { %2261 = vmatprep.subr.bf16.mxu0 %v2576_v0 }
 0xbad   :  { %2129 = vmatmul.mubr.msk.f32.vlgmr.msra.gmra.mrb[16].mxu0 %vm175_vm1, %v1524_v41 }
 0xbae   :  { %2263 = vmatpush3.bf16.msra.mxu0 %v2781_v19  ;;  %2150 = vmatprep.mubr.msk.f32.mxu0 %vm2577_vm0, %v2578_v1 }
 0xbaf   :  { %2264 = vmatprep.subr.bf16.mxu0 %v2576_v0 }
 0xbb2   :  { %2266 = vmatpush3.bf16.msra.mxu0 %v2788_v26 }
 0xbb5   :  { %2151 = vmatmul.mubr.msk.f32.vlgmr.msra.gmra.mrb[18].mxu0 %vm175_vm1, %v1524_v41 }
 0xc78   :  { %v1413_v60 = vpop.f32.mrb[14].mxu0 }
 0xc79   :  { %v1484_v28 = vadd.f32 %v1483_v25, %v1413_v60  ;;  %v2108_v29 = vpop.f32.mrb[15].mxu0 }
 0xc7b   :  { %v1487_v30 = vadd.f32 %v2816_v37, %v1484_v28 }
 0xc7d   :  { %2316 = vtanh.f32 %v1487_v30  ;;  %v1842_v32 = vmul.f32 -1.442695, %v1487_v30 }
 0xc7f   :  { %2318 = vpow2.f32 %v1842_v32 }
 0xc80   :  { %v1594_v45 = vpop.f32.mrb[16].mxu0 }
 0xc81   :  { %1767 = vst.msk [vmem:[#allocation16 + $0x28] sm:$0xff] %vm503_vm2, %v1594_v45  ;;  %v2130_v19 = vpop.f32.mrb[17].mxu0 }
 0xc87   :  { %v2317_v31 = vpop.eup %2316 }
 0xc88   :  { %1498 = vrot.lane.b32.xlu0 %v2317_v31, %s2579_s16  ;;  %v1736_v46 = vpop.f32.mrb[18].mxu0 }
 0xc89   :  { %v2319_v5 = vpop.eup %2318  ;;  %v2152_v47 = vpop.f32.mrb[19].mxu0 }
 0xc8a   :  { %v1491_v33 = vadd.f32 1.0, %v2319_v5 }
 0xc8c   :  { %2320 = vrcp.f32 %v1491_v33 }
 0xc96   :  { %v2321_v34 = vpop.eup %2320 }
 0xc97   :  { %v1496_v38 = vmul.f32 %v2321_v34, %v1495_v12 }
 0xcfa   :  { %v1499_v35 = vpop.permute.xlu0 %1498 }
 0xcfb   :  { %v1501_v36 = vmul.f32 %v2321_v34, %v1499_v35 }
 0xcfd   :  { %1503 = vrot.lane.b32.xlu1 %v1501_v36, %s2580_s17 }
 0xd6f   :  { %v1504_v39 = vpop.permute.xlu1 %1503 }
 0xd70   :  { %v1506_v40 = vadd.f32 %v1504_v39, %v1496_v38 }
 0xd72   :  { %2322 = vtanh.f32 %v1506_v40  ;;  %1522 = vst.msk [vmem:[#allocation17 + $0x20] sm:$0xff] %vm175_vm1, %v1506_v40  ;;  %v1748_v59 = vmul.f32 %v2824_v48, %v1506_v40 }
 0xd7c   :  { %v2323_v42 = vpop.eup %2322 }
 0xd7d   :  { %1509 = vrot.lane.b32.xlu0 %v2323_v42, %s2579_s16 }
 0xdef   :  { %v1510_v43 = vpop.permute.xlu0 %1509 }
 0xdf0   :  { %v1512_v44 = vmul.f32 %v2321_v34, %v1510_v43 }
 0xdf2   :  { %1516 = vrot.lane.b32.xlu1 %v1512_v44, %s2579_s16 }
 0xe64   :  { %v1517_v1 = vpop.permute.xlu1 %1516 }
 0xe65   :  { %1843 = vst.msk [vmem:[%s3042_s12 + $0x20] sm:$0xff] %vm175_vm1, %v1517_v1  ;;  %2140 = vmatmul.mubr.msk.f32.vlgmr.msra.gmra.mrb[16].mxu1 %vm175_vm1, %v1517_v1 }
 0xf38   :  { %v1666_v0 = vpop.f32.mrb[16].mxu1 }
 0xf39   :  { %v1737_v26 = vadd.f32 %v1736_v46, %v1666_v0  ;;  %v2141_v49 = vpop.f32.mrb[17].mxu1 }
 0xf3b   :  { %v1740_v50 = vadd.f32 %v2816_v37, %v1737_v26 }
 0xf3d   :  { %2324 = vtanh.f32 %v1740_v50  ;;  %v1847_v52 = vmul.f32 -1.442695, %v1740_v50 }
 0xf3f   :  { %2326 = vpow2.f32 %v1847_v52 }
 0xf47   :  { %v2325_v51 = vpop.eup %2324 }
 0xf48   :  { %1751 = vrot.lane.b32.xlu0 %v2325_v51, %s2579_s16 }
 0xf49   :  { %v2327_v53 = vpop.eup %2326 }
 0xf4a   :  { %v1744_v54 = vadd.f32 1.0, %v2327_v53 }
 0xf4c   :  { %2328 = vrcp.f32 %v1744_v54 }
 0xf56   :  { %v2329_v55 = vpop.eup %2328 }
 0xf57   :  { %v1749_v61 = vmul.f32 %v2329_v55, %v1748_v59 }
 0xfba   :  { %v1752_v56 = vpop.permute.xlu0 %1751 }
 0xfbb   :  { %v1754_v58 = vmul.f32 %v2329_v55, %v1752_v56 }
 0xfbd   :  { %1756 = vrot.lane.b32.xlu1 %v1754_v58, %s2580_s17 }
0x102f   :  { %v1757_v62 = vpop.permute.xlu1 %1756 }
0x1030   :  { %v1759_v63 = vadd.f32 %v1757_v62, %v1749_v61 }
0x1032   :  { %2330 = vtanh.f32 %v1759_v63  ;;  %1775 = vst.msk [vmem:[#allocation17 + $0x28] sm:$0xff] %vm175_vm1, %v1759_v63 }
0x103c   :  { %v2331_v37 = vpop.eup %2330 }
0x103d   :  { %1762 = vrot.lane.b32.xlu0 %v2331_v37, %s2579_s16 }
0x103e   :  { %2519 = shalt.err (!%p2516_p12)
}
0x103f   :  { %s2520_s22 = scalar_lea.hbm %s3041_s11, 768 }
0x1040   :  { %p2521_p13 = scmp.ne.s32.totalorder %s3041_s11, %s2520_s22  ;;  %p2524_p0 = scmp.lt.u32.totalorder %s2520_s22, %s3041_s11 }
0x1042   :  { %p2526_p1 = pnand %p2524_p0, %p2521_p13 }
0x1044   :  { %2529 = shalt.err (!%p2526_p1)
}
0x1045   :  { %1787 = dma.vmem_to_hbm [thread:$0]  %s1782_s28, 768, %s3041_s11, [#allocation4], %s2569_s26, %s2569_s26, %s2570_s15  }
0x1046   :  { %s2530_s0 = scalar_lea.vmem %s2988_s2, 768  ;;  %p2535_p3 = scmp.lt.s32.totalorder %s2988_s2, %s2988_s2 }
0x1047   :  { %p2531_p2 = scmp.ne.s32.totalorder %s2988_s2, %s2530_s0  ;;  %p2536_p4 = scmp.lt.s32.totalorder %s2530_s0, %s2530_s0 }
0x1049   :  { %p2537_p5 = por %p2536_p4, %p2535_p3 }
0x104b   :  { %p2538_p6 = pnand %p2537_p5, %p2531_p2 }
0x104d   :  { %2541 = shalt.err (!%p2538_p6)
}
0x104e   :  { %s2542_s18 = scalar_lea.hbm %s3043_s13, 768 }
0x104f   :  { %p2543_p7 = scmp.ne.s32.totalorder %s3043_s13, %s2542_s18  ;;  %p2546_p8 = scmp.lt.u32.totalorder %s2542_s18, %s3043_s13 }
0x1051   :  { %p2548_p9 = pnand %p2546_p8, %p2543_p7 }
0x1053   :  { %2551 = shalt.err (!%p2548_p9)
}
0x1054   :  { %1801 = dma.vmem_to_hbm [thread:$0]  %s2988_s2, 768, %s3043_s13, [#allocation18], %s2569_s26, %s2569_s26, %s2570_s15  }
0x10af   :  { %v1763_v48 = vpop.permute.xlu0 %1762 }
0x10b0   :  { %v1765_v2 = vmul.f32 %v2329_v55, %v1763_v48 }
0x10b2   :  { %1769 = vrot.lane.b32.xlu1 %v1765_v2, %s2579_s16 }
0x1124   :  { %v1770_v3 = vpop.permute.xlu1 %1769 }
0x1125   :  { %1848 = vst.msk [vmem:[%s3042_s12 + $0x28] sm:$0xff] %vm175_vm1, %v1770_v3 }
0x1126   :  { %2562 = dma.done.wait [#allocation4], 768  }
0x1127   :  { %2563 = vsyncadd [#allocation4], 4294966528 }
0x1128   :  { %2564 = dma.done.wait [#allocation18], 768  }
0x1129   :  { %2565 = vsyncadd [#allocation18], 4294966528 }
0x112a   :  { %1810 = vsyncpa [#allocation3], 1 }
0x112b   :  { %1811 = vsyncpa [#allocation6], 1 }
0x112c   :  { %1812 = vsyncpa [#allocation9], 1 }
0x112d   :  { %1813 = vsyncpa [#allocation12], 1 }
0x112e   :  { %1814 = vsyncpa [#allocation15], 1 }
0x112f   :  { %1815 = vsyncpa [#allocation4], 1 }
0x1130   :  { %1816 = vsyncpa [#allocation18], 1 }

</bundles_post_ra>
